<compile_context>
chip_gen: v7x
topology: tpu7x:2x2x1
jax: 0.10.0
libtpu: 0.0.40
codegen_flags: <defaults>
</compile_context>

<pallas_src>
import math

import jax
import jax.numpy as jnp
from jax.experimental import pallas as pl
from jax.experimental.pallas import tpu as pltpu

IN_DIM = 2048
HID_DIM = 256
BN_EPS = 1e-5


def _round_up(v, m):
    return (v + m - 1) // m * m


def _make_fc1_stats_kernel(n_valid):
    """fc1 (bf16 matmul, f32 accumulate) + masked per-tile batch sum / sum-sq."""

    def kernel(x_ref, w1_ref, b1_ref, h_ref, sum_ref, sq_ref):
        i = pl.program_id(0)
        # f32 x tile -> bf16 right before the MXU; the VPU cast hides under DMA.
        h = jnp.dot(x_ref[...].astype(jnp.bfloat16), w1_ref[...],
                    preferred_element_type=jnp.float32)
        h = h + b1_ref[...]
        h_ref[...] = h.astype(jnp.bfloat16)           # bf16 HBM round-trip for h

        tm = h.shape[0]
        row = i * tm + jax.lax.broadcasted_iota(jnp.int32, (tm, 1), 0)
        hm = jnp.where(row < n_valid, h, 0.0)         # NaN-safe mask of padded rows
        sum_ref[...] = jnp.sum(hm, axis=0, keepdims=True).reshape(1, 1, HID_DIM)
        sq_ref[...] = jnp.sum(hm * hm, axis=0, keepdims=True).reshape(1, 1, HID_DIM)

    return kernel


def _bn_relu_fc2_kernel(h_ref, scale_ref, shift_ref, w2_ref, b2_ref, out_ref):
    h = h_ref[...].astype(jnp.float32) * scale_ref[...] + shift_ref[...]  # folded BN
    h = jnp.maximum(h, 0.0)                                               # ReLU
    # Dropout is identity here (module-level training=False branch).
    logits = jnp.dot(h.astype(jnp.bfloat16), w2_ref[...],
                     preferred_element_type=jnp.float32)
    out_ref[...] = logits + b2_ref[...]


def res_classifier_forward(x, w1, b1, gamma, beta, w2, b2, *, tm=None):
    """x: (N, 2048) float32. Returns logits (N, class_num) float32."""
    n = x.shape[0]
    class_num = w2.shape[1]

    # Phase-1 batch tile: 1024 rows for big batches (fits v7x 64 MiB VMEM with the
    # double-buffered f32 x stream), otherwise the batch rounded to the bf16
    # sublane (16, since h is stored bf16).
    if tm is None:
        tm = 1024 if n >= 1024 else _round_up(max(n, 16), 16)
    tm = _round_up(tm, 16)
    n_pad = _round_up(n, tm)
    num_tiles = n_pad // tm
    c_pad = _round_up(max(class_num, 128), 128)       # lane-dense logit stores

    # x stays f32 (no wrapper-side cast); pad the batch only when the tile needs it.
    x_p = x if n_pad == n else jnp.pad(x, ((0, n_pad - n), (0, 0)))
    w1_b = w1.astype(jnp.bfloat16)
    b1_f = b1.astype(jnp.float32)
    w2_p = jnp.pad(w2, ((0, 0), (0, c_pad - class_num))).astype(jnp.bfloat16)
    b2_p = jnp.pad(b2, ((0, 0), (0, c_pad - class_num))).astype(jnp.float32)

    # ---------------- phase 1: fc1 + per-tile batch statistics -----------------
    vmem1 = (2 * (tm * IN_DIM * 4 + tm * HID_DIM * 2)          # x / h tiles (dbl buf)
             + 2 * (IN_DIM * HID_DIM * 2 + HID_DIM * 4)        # W1 / b1 resident
             + 4 * (HID_DIM * 4)                               # tiny partial buffers
             + (4 << 20))                                      # headroom
    vmem1 = min(vmem1, 56 << 20)                               # stay under v7x 64 MiB
    bytes1 = (x_p.size * 4 + w1_b.size * 2 + HID_DIM * 4
              + n_pad * HID_DIM * 2 + 2 * num_tiles * HID_DIM * 4)

    h, sum_parts, sq_parts = pl.pallas_call(
        _make_fc1_stats_kernel(n),
        out_shape=(
            jax.ShapeDtypeStruct((n_pad, HID_DIM), jnp.bfloat16),      # h (bf16)
            jax.ShapeDtypeStruct((num_tiles, 1, HID_DIM), jnp.float32),  # sum(h)
            jax.ShapeDtypeStruct((num_tiles, 1, HID_DIM), jnp.float32),  # sum(h*h)
        ),
        grid=(num_tiles,),
        in_specs=[
            pl.BlockSpec((tm, IN_DIM), lambda i: (i, 0)),        # x tile (f32 stream)
            pl.BlockSpec((IN_DIM, HID_DIM), lambda i: (0, 0)),   # W1 resident
            pl.BlockSpec((1, HID_DIM), lambda i: (0, 0)),        # b1 resident
        ],
        out_specs=(
            pl.BlockSpec((tm, HID_DIM), lambda i: (i, 0)),       # h tile
            pl.BlockSpec((1, 1, HID_DIM), lambda i: (i, 0, 0)),  # per-tile sum
            pl.BlockSpec((1, 1, HID_DIM), lambda i: (i, 0, 0)),  # per-tile sumsq
        ),
        compiler_params=pltpu.CompilerParams(
            dimension_semantics=("parallel",),                   # megacore shardable
            vmem_limit_bytes=vmem1),
        cost_estimate=pl.CostEstimate(
            flops=2 * n_pad * IN_DIM * HID_DIM,
            transcendentals=0,
            bytes_accessed=bytes1),
    )(x_p, w1_b, b1_f)

    # ---- fold BN (batch stats, biased variance) into scale / shift, in f32 ----
    inv_n = 1.0 / n
    h_sum = jnp.sum(sum_parts, axis=0)                 # (1, 256)
    h_sq = jnp.sum(sq_parts, axis=0)
    mean = h_sum * inv_n
    var = jnp.maximum(h_sq * inv_n - mean * mean, 0.0)
    inv_std = jax.lax.rsqrt(var + BN_EPS)
    scale = (gamma * inv_std).astype(jnp.float32)
    shift = (beta - mean * scale).astype(jnp.float32)

    # ---------------- phase 2: BN apply + ReLU + fc2 ---------------------------
    # Phase-2 tile: largest multiple of the phase-1 tile that divides n_pad while
    # keeping the double-buffered h + logits footprint well inside VMEM.
    row_bytes2 = HID_DIM * 2 + c_pad * 4
    tm2_target = max(tm, min(4096, ((24 << 20) // (2 * row_bytes2)) // 16 * 16))
    max_k = max(1, min(num_tiles, tm2_target // tm))
    k = max(d for d in range(1, max_k + 1) if num_tiles % d == 0)
    tm2 = k * tm
    num_tiles2 = n_pad // tm2

    vmem2 = (2 * (tm2 * HID_DIM * 2 + tm2 * c_pad * 4)          # h / logits tiles
             + 2 * (HID_DIM * c_pad * 2 + c_pad * 4 + 2 * HID_DIM * 4)  # residents
             + (4 << 20))
    vmem2 = min(vmem2, 56 << 20)
    bytes2 = (n_pad * HID_DIM * 2 + 2 * HID_DIM * 4 + w2_p.size * 2
              + c_pad * 4 + n_pad * c_pad * 4)

    logits_pad = pl.pallas_call(
        _bn_relu_fc2_kernel,
        out_shape=jax.ShapeDtypeStruct((n_pad, c_pad), jnp.float32),
        grid=(num_tiles2,),
        in_specs=[
            pl.BlockSpec((tm2, HID_DIM), lambda i: (i, 0)),      # h tile (bf16)
            pl.BlockSpec((1, HID_DIM), lambda i: (0, 0)),        # scale resident
            pl.BlockSpec((1, HID_DIM), lambda i: (0, 0)),        # shift resident
            pl.BlockSpec((HID_DIM, c_pad), lambda i: (0, 0)),    # W2 resident
            pl.BlockSpec((1, c_pad), lambda i: (0, 0)),          # b2 resident
        ],
        out_specs=pl.BlockSpec((tm2, c_pad), lambda i: (i, 0)),
        compiler_params=pltpu.CompilerParams(
            dimension_semantics=("parallel",),                   # row-parallel
            vmem_limit_bytes=vmem2),
        cost_estimate=pl.CostEstimate(
            flops=2 * n_pad * HID_DIM * c_pad,
            transcendentals=0,
            bytes_accessed=bytes2),
    )(h, scale, shift, w2_p, b2_p)

    return logits_pad[:n, :class_num]


def init_params(key, class_num):
    """Deterministic synthetic parameters matching the module's shapes."""
    k1, k2, k3, k4 = jax.random.split(key, 4)
    bound1 = 1.0 / math.sqrt(IN_DIM)
    bound2 = 1.0 / math.sqrt(HID_DIM)
    w1 = jax.random.uniform(k1, (IN_DIM, HID_DIM), jnp.float32, -bound1, bound1)
    b1 = jax.random.uniform(k2, (1, HID_DIM), jnp.float32, -bound1, bound1)
    gamma = jnp.ones((1, HID_DIM), jnp.float32)    # BatchNorm1d affine weight
    beta = jnp.zeros((1, HID_DIM), jnp.float32)    # BatchNorm1d affine bias
    w2 = jax.random.uniform(k3, (HID_DIM, class_num), jnp.float32, -bound2, bound2)
    b2 = jax.random.uniform(k4, (1, class_num), jnp.float32, -bound2, bound2)
    return w1, b1, gamma, beta, w2, b2


def reference_forward(x, w1, b1, gamma, beta, w2, b2):
    """Pure-JAX reference with the same bf16-matmul / f32-accumulate model."""
    h = jnp.dot(x.astype(jnp.bfloat16), w1.astype(jnp.bfloat16),
                preferred_element_type=jnp.float32) + b1
    mean = h.mean(axis=0, keepdims=True)
    var = (h * h).mean(axis=0, keepdims=True) - mean * mean
    h = (h - mean) * jax.lax.rsqrt(var + BN_EPS) * gamma + beta
    h = jnp.maximum(h, 0.0)
    return jnp.dot(h.astype(jnp.bfloat16), w2.astype(jnp.bfloat16),
                   preferred_element_type=jnp.float32) + b2


if __name__ == "__main__":
    key = jax.random.PRNGKey(0)
    forward = jax.jit(res_classifier_forward)

    # Case 1: tiny batch (tests batch-row masking: N=8 padded to the 16-row tile).
    kx, kp = jax.random.split(key)
    N1, C1 = 8, 16
    x1 = jax.random.normal(kx, (N1, IN_DIM), jnp.float32)
    p1 = init_params(kp, C1)
    out1 = jax.block_until_ready(forward(x1, *p1))
    ref1 = reference_forward(x1, *p1)
    assert out1.shape == (N1, C1)
    assert jnp.allclose(out1, ref1, atol=2e-2, rtol=2e-2), "mismatch (case 1)"

    # Case 2: multi-tile batch (tests cross-tile partial-sum BN-stat reduction).
    kx2, kp2 = jax.random.split(jax.random.PRNGKey(1))
    N2, C2 = 40, 10
    x2 = jax.random.normal(kx2, (N2, IN_DIM), jnp.float32)
    p2 = init_params(kp2, C2)
    out2 = jax.block_until_ready(res_classifier_forward(x2, *p2, tm=16))
    ref2 = reference_forward(x2, *p2)
    assert out2.shape == (N2, C2)
    assert jnp.allclose(out2, ref2, atol=2e-2, rtol=2e-2), "mismatch (case 2)"

    print("KERNEL_OK")
</pallas_src>

<mosaic_0001>
module attributes {stable_mosaic.version = 11 : i64} {
  func.func @kernel(%arg0: i32, %arg1: memref<16x2048xf32, #tpu.memory_space<vmem>>, %arg2: memref<2048x256xbf16, #tpu.memory_space<vmem>>, %arg3: memref<1x256xf32, #tpu.memory_space<vmem>>, %arg4: memref<16x256xbf16, #tpu.memory_space<vmem>>, %arg5: memref<1x1x256xf32, #tpu.memory_space<vmem>>, %arg6: memref<1x1x256xf32, #tpu.memory_space<vmem>>) attributes {dimension_semantics = [#tpu.dimension_semantics<parallel>], iteration_bounds = array<i64: 1>, scalar_prefetch = 0 : i64, scratch_operands = 0 : i64, tpu.core_type = #tpu.core_type<tc>, window_params = [{transform_indices = @transform_0, window_bounds = array<i64: 16, 2048>}, {pipeline_mode = #tpu.pipeline_mode<synchronous>, transform_indices = @transform_1, window_bounds = array<i64: 2048, 256>}, {pipeline_mode = #tpu.pipeline_mode<synchronous>, transform_indices = @transform_2, window_bounds = array<i64: 1, 256>}, {transform_indices = @transform_3, window_bounds = array<i64: 16, 256>}, {transform_indices = @transform_4, window_bounds = array<i64: 1, 1, 256>}, {transform_indices = @transform_5, window_bounds = array<i64: 1, 1, 256>}]} {
    %c0 = arith.constant 0 : index
    %c0_0 = arith.constant 0 : index
    %0 = vector.load %arg1[%c0, %c0_0] : memref<16x2048xf32, #tpu.memory_space<vmem>>, vector<16x2048xf32>
    %1 = arith.truncf %0 : vector<16x2048xf32> to vector<16x2048xbf16>
    %c0_1 = arith.constant 0 : index
    %c0_2 = arith.constant 0 : index
    %2 = vector.load %arg2[%c0_1, %c0_2] : memref<2048x256xbf16, #tpu.memory_space<vmem>>, vector<2048x256xbf16>
    %cst = arith.constant dense<0.000000e+00> : vector<16x256xf32>
    %3 = tpu.matmul %1, %2, %cst {dimension_numbers = #tpu.dot_dimension_numbers<[1], [0], [0], [1], [0, 0, 1, 1], [], []>} : vector<16x2048xbf16>, vector<2048x256xbf16>, vector<16x256xf32> -> vector<16x256xf32>
    %c0_3 = arith.constant 0 : index
    %c0_4 = arith.constant 0 : index
    %4 = vector.load %arg3[%c0_3, %c0_4] : memref<1x256xf32, #tpu.memory_space<vmem>>, vector<1x256xf32>
    %5 = vector.broadcast %4 : vector<1x256xf32> to vector<16x256xf32>
    %6 = arith.addf %3, %5 : vector<16x256xf32>
    %7 = arith.truncf %6 : vector<16x256xf32> to vector<16x256xbf16>
    %c0_5 = arith.constant 0 : index
    %c0_6 = arith.constant 0 : index
    %8 = vector.load %arg4[%c0_5, %c0_6] : memref<16x256xbf16, #tpu.memory_space<vmem>>, vector<16x256xbf16>
    tpu.vector_store %arg4[%c0_5, %c0_6], %7 {strides = array<i32>} : memref<16x256xbf16, #tpu.memory_space<vmem>>, vector<16x256xbf16>,
    %c16_i32 = arith.constant 16 : i32
    %9 = arith.muli %arg0, %c16_i32 : i32
    %10 = tpu.iota {dimensions = array<i32: 0>} : vector<16x1xi32>
    %11 = vector.broadcast %9 : i32 to vector<16x1xi32>
    %12 = arith.addi %11, %10 : vector<16x1xi32>
    %c8_i32 = arith.constant 8 : i32
    %13 = vector.broadcast %c8_i32 : i32 to vector<16x1xi32>
    %14 = arith.cmpi slt, %12, %13 : vector<16x1xi32>
    %cst_7 = arith.constant 0.000000e+00 : f32
    %15 = vector.shape_cast %14 : vector<16x1xi1> to vector<16x1xi1>
    %16 = vector.broadcast %15 : vector<16x1xi1> to vector<16x256xi1>
    %17 = vector.broadcast %cst_7 : f32 to vector<16x256xf32>
    %18 = arith.select %16, %6, %17 : vector<16x256xi1>, vector<16x256xf32>
    %cst_8 = arith.constant dense<0.000000e+00> : vector<256xf32>
    %19 = vector.multi_reduction <add>, %18, %cst_8 [0] : vector<16x256xf32> to vector<256xf32>
    %20 = vector.shape_cast %19 : vector<256xf32> to vector<1x256xf32>
    %21 = vector.shape_cast %20 : vector<1x256xf32> to vector<1x1x256xf32>
    %c0_9 = arith.constant 0 : index
    %c0_10 = arith.constant 0 : index
    %c0_11 = arith.constant 0 : index
    %22 = vector.load %arg5[%c0_9, %c0_10, %c0_11] : memref<1x1x256xf32, #tpu.memory_space<vmem>>, vector<1x1x256xf32>
    tpu.vector_store %arg5[%c0_9, %c0_10, %c0_11], %21 {strides = array<i32>} : memref<1x1x256xf32, #tpu.memory_space<vmem>>, vector<1x1x256xf32>,
    %23 = arith.mulf %18, %18 : vector<16x256xf32>
    %cst_12 = arith.constant dense<0.000000e+00> : vector<256xf32>
    %24 = vector.multi_reduction <add>, %23, %cst_12 [0] : vector<16x256xf32> to vector<256xf32>
    %25 = vector.shape_cast %24 : vector<256xf32> to vector<1x256xf32>
    %26 = vector.shape_cast %25 : vector<1x256xf32> to vector<1x1x256xf32>
    %c0_13 = arith.constant 0 : index
    %c0_14 = arith.constant 0 : index
    %c0_15 = arith.constant 0 : index
    %27 = vector.load %arg6[%c0_13, %c0_14, %c0_15] : memref<1x1x256xf32, #tpu.memory_space<vmem>>, vector<1x1x256xf32>
    tpu.vector_store %arg6[%c0_13, %c0_14, %c0_15], %26 {strides = array<i32>} : memref<1x1x256xf32, #tpu.memory_space<vmem>>, vector<1x1x256xf32>,
    return
  }
  func.func @transform_0(%arg0: i32) -> (i32, i32) {
    %c0_i32 = arith.constant 0 : i32
    %c0_i32_0 = arith.constant 0 : i32
    return %arg0, %c0_i32 : i32, i32
  }
  func.func @transform_1(%arg0: i32) -> (i32, i32) {
    %c0_i32 = arith.constant 0 : i32
    %c0_i32_0 = arith.constant 0 : i32
    %c0_i32_1 = arith.constant 0 : i32
    return %c0_i32, %c0_i32_0 : i32, i32
  }
  func.func @transform_2(%arg0: i32) -> (i32, i32) {
    %c0_i32 = arith.constant 0 : i32
    %c0_i32_0 = arith.constant 0 : i32
    %c0_i32_1 = arith.constant 0 : i32
    return %c0_i32, %c0_i32_0 : i32, i32
  }
  func.func @transform_3(%arg0: i32) -> (i32, i32) {
    %c0_i32 = arith.constant 0 : i32
    %c0_i32_0 = arith.constant 0 : i32
    return %arg0, %c0_i32 : i32, i32
  }
  func.func @transform_4(%arg0: i32) -> (i32, i32, i32) {
    %c0_i32 = arith.constant 0 : i32
    %c0_i32_0 = arith.constant 0 : i32
    %c0_i32_1 = arith.constant 0 : i32
    return %arg0, %c0_i32, %c0_i32_0 : i32, i32, i32
  }
  func.func @transform_5(%arg0: i32) -> (i32, i32, i32) {
    %c0_i32 = arith.constant 0 : i32
    %c0_i32_0 = arith.constant 0 : i32
    %c0_i32_1 = arith.constant 0 : i32
    return %arg0, %c0_i32, %c0_i32_0 : i32, i32, i32
  }
}

module attributes {stable_mosaic.version = 11 : i64} {
  func.func @_bn_relu_fc2_kernel(%arg0: i32, %arg1: memref<16x256xbf16, #tpu.memory_space<vmem>>, %arg2: memref<1x256xf32, #tpu.memory_space<vmem>>, %arg3: memref<1x256xf32, #tpu.memory_space<vmem>>, %arg4: memref<256x128xbf16, #tpu.memory_space<vmem>>, %arg5: memref<1x128xf32, #tpu.memory_space<vmem>>, %arg6: memref<16x128xf32, #tpu.memory_space<vmem>>) attributes {dimension_semantics = [#tpu.dimension_semantics<parallel>], iteration_bounds = array<i64: 1>, scalar_prefetch = 0 : i64, scratch_operands = 0 : i64, tpu.core_type = #tpu.core_type<tc>, window_params = [{transform_indices = @transform_0, window_bounds = array<i64: 16, 256>}, {pipeline_mode = #tpu.pipeline_mode<synchronous>, transform_indices = @transform_1, window_bounds = array<i64: 1, 256>}, {pipeline_mode = #tpu.pipeline_mode<synchronous>, transform_indices = @transform_2, window_bounds = array<i64: 1, 256>}, {pipeline_mode = #tpu.pipeline_mode<synchronous>, transform_indices = @transform_3, window_bounds = array<i64: 256, 128>}, {pipeline_mode = #tpu.pipeline_mode<synchronous>, transform_indices = @transform_4, window_bounds = array<i64: 1, 128>}, {transform_indices = @transform_5, window_bounds = array<i64: 16, 128>}]} {
    %c0 = arith.constant 0 : index
    %c0_0 = arith.constant 0 : index
    %0 = vector.load %arg1[%c0, %c0_0] : memref<16x256xbf16, #tpu.memory_space<vmem>>, vector<16x256xbf16>
    %1 = arith.extf %0 : vector<16x256xbf16> to vector<16x256xf32>
    %c0_1 = arith.constant 0 : index
    %c0_2 = arith.constant 0 : index
    %2 = vector.load %arg2[%c0_1, %c0_2] : memref<1x256xf32, #tpu.memory_space<vmem>>, vector<1x256xf32>
    %3 = vector.broadcast %2 : vector<1x256xf32> to vector<16x256xf32>
    %4 = arith.mulf %1, %3 : vector<16x256xf32>
    %c0_3 = arith.constant 0 : index
    %c0_4 = arith.constant 0 : index
    %5 = vector.load %arg3[%c0_3, %c0_4] : memref<1x256xf32, #tpu.memory_space<vmem>>, vector<1x256xf32>
    %6 = vector.broadcast %5 : vector<1x256xf32> to vector<16x256xf32>
    %7 = arith.addf %4, %6 : vector<16x256xf32>
    %cst = arith.constant 0.000000e+00 : f32
    %8 = vector.broadcast %cst : f32 to vector<16x256xf32>
    %9 = arith.maximumf %7, %8 : vector<16x256xf32>
    %10 = arith.truncf %9 : vector<16x256xf32> to vector<16x256xbf16>
    %c0_5 = arith.constant 0 : index
    %c0_6 = arith.constant 0 : index
    %11 = vector.load %arg4[%c0_5, %c0_6] : memref<256x128xbf16, #tpu.memory_space<vmem>>, vector<256x128xbf16>
    %cst_7 = arith.constant dense<0.000000e+00> : vector<16x128xf32>
    %12 = tpu.matmul %10, %11, %cst_7 {dimension_numbers = #tpu.dot_dimension_numbers<[1], [0], [0], [1], [0, 0, 1, 1], [], []>} : vector<16x256xbf16>, vector<256x128xbf16>, vector<16x128xf32> -> vector<16x128xf32>
    %c0_8 = arith.constant 0 : index
    %c0_9 = arith.constant 0 : index
    %13 = vector.load %arg5[%c0_8, %c0_9] : memref<1x128xf32, #tpu.memory_space<vmem>>, vector<1x128xf32>
    %14 = vector.broadcast %13 : vector<1x128xf32> to vector<16x128xf32>
    %15 = arith.addf %12, %14 : vector<16x128xf32>
    %c0_10 = arith.constant 0 : index
    %c0_11 = arith.constant 0 : index
    %16 = vector.load %arg6[%c0_10, %c0_11] : memref<16x128xf32, #tpu.memory_space<vmem>>, vector<16x128xf32>
    tpu.vector_store %arg6[%c0_10, %c0_11], %15 {strides = array<i32>} : memref<16x128xf32, #tpu.memory_space<vmem>>, vector<16x128xf32>,
    return
  }
  func.func @transform_0(%arg0: i32) -> (i32, i32) {
    %c0_i32 = arith.constant 0 : i32
    %c0_i32_0 = arith.constant 0 : i32
    return %arg0, %c0_i32 : i32, i32
  }
  func.func @transform_1(%arg0: i32) -> (i32, i32) {
    %c0_i32 = arith.constant 0 : i32
    %c0_i32_0 = arith.constant 0 : i32
    %c0_i32_1 = arith.constant 0 : i32
    return %c0_i32, %c0_i32_0 : i32, i32
  }
  func.func @transform_2(%arg0: i32) -> (i32, i32) {
    %c0_i32 = arith.constant 0 : i32
    %c0_i32_0 = arith.constant 0 : i32
    %c0_i32_1 = arith.constant 0 : i32
    return %c0_i32, %c0_i32_0 : i32, i32
  }
  func.func @transform_3(%arg0: i32) -> (i32, i32) {
    %c0_i32 = arith.constant 0 : i32
    %c0_i32_0 = arith.constant 0 : i32
    %c0_i32_1 = arith.constant 0 : i32
    return %c0_i32, %c0_i32_0 : i32, i32
  }
  func.func @transform_4(%arg0: i32) -> (i32, i32) {
    %c0_i32 = arith.constant 0 : i32
    %c0_i32_0 = arith.constant 0 : i32
    %c0_i32_1 = arith.constant 0 : i32
    return %c0_i32, %c0_i32_0 : i32, i32
  }
  func.func @transform_5(%arg0: i32) -> (i32, i32) {
    %c0_i32 = arith.constant 0 : i32
    %c0_i32_0 = arith.constant 0 : i32
    return %arg0, %c0_i32 : i32, i32
  }
}

</mosaic_0001>

<bundles_post_ra>
// kernel: res_classifier_forward.3
= control target key start
LH: loop header
LB: loop body
LE: loop exit
PB: predicated region body
PF: predicated region fallthrough
CT: control target
= control target key end

     0   :  { %v29_v5 = vlaneseq  ;;  %s401_s3 = inlined_call_operand.vmem [shape: bf16[256,128], index: 3, kind: input, shape index: {}]   ;;  %s402_s0 = inlined_call_operand.vmem [shape: bf16[16,256], index: 0, kind: input, shape index: {}]   ;;  %s403_s1 = inlined_call_operand.vmem [shape: f32[1,256], index: 1, kind: input, shape index: {}]   ;;  %s404_s2 = inlined_call_operand.vmem [shape: f32[1,256], index: 2, kind: input, shape index: {}]   ;;  %s405_s4 = inlined_call_operand.vmem [shape: f32[1,128], index: 4, kind: input, shape index: {}]   ;;  %s406_s5 = inlined_call_operand.vmem [shape: f32[16,128], index: 5, kind: output, shape index: {}]  }
   0x1   :  { %v286_v0 = vld [vmem:[%s401_s3 + $0x40] sm:$0xff]   ;;  %v288_v2 = vld [vmem:[%s401_s3 + $0x48] sm:$0xff]   ;;  %v290_v4 = vld [vmem:[%s401_s3 + $0x50] sm:$0xff]  }
   0x2   :  { %v287_v1 = vld [vmem:[%s401_s3] sm:$0xff]   ;;  %264 = vmatprep.subr.bf16.mxu0 %v286_v0  ;;  %v289_v3 = vld [vmem:[%s401_s3 + $0x8] sm:$0xff]   ;;  %v291_v6 = vld [vmem:[%s401_s3 + $0x10] sm:$0xff]   ;;  %v30_v8 = vshrl.u32 %v29_v5, 7 }
   0x3   :  { %265 = vmatpush3.bf16.msra.mxu0 %v287_v1  ;;  %v292_v7 = vld [vmem:[%s401_s3 + $0x58] sm:$0xff]   ;;  %v294_v10 = vld [vmem:[%s401_s3 + $0x60] sm:$0xff]   ;;  %v296_v14 = vld [vmem:[%s401_s3 + $0x68] sm:$0xff]  }
   0x4   :  { %266 = vmatprep.subr.bf16.mxu0 %v288_v2  ;;  %v293_v9 = vld [vmem:[%s401_s3 + $0x18] sm:$0xff]   ;;  %v31_v11 = vsub.s32 0, %v30_v8  ;;  %v295_v12 = vld [vmem:[%s401_s3 + $0x20] sm:$0xff]   ;;  %v35_v13 = vsub.s32 1, %v30_v8  ;;  %v22_v16 = vld [vmem:[%s402_s0 + $0x8] sm:$0xff] }
   0x5   :  { %v21_v15 = vld [vmem:[%s402_s0] sm:$0xff]  ;;  %v25_v20 = vunpack.c.l.bf16 %v22_v16  ;;  %v26_v21 = vunpack.c.h.bf16 %v22_v16  ;;  %v297_v27 = vld [vmem:[%s401_s3 + $0x28] sm:$0xff]   ;;  %v298_v28 = vld [vmem:[%s401_s3 + $0x70] sm:$0xff]  }
   0x6   :  { %v27_v17 = vld [vmem:[%s403_s1] sm:$0x3]  ;;  %v23_v18 = vunpack.c.l.bf16 %v21_v15  ;;  %v24_v19 = vunpack.c.h.bf16 %v21_v15  ;;  %v299_v37 = vld [vmem:[%s401_s3 + $0x30] sm:$0xff]   ;;  %v300_v38 = vld [vmem:[%s401_s3 + $0x78] sm:$0xff]  }
   0x7   :  { %267 = vmatpush3.bf16.msra.mxu0 %v289_v3  ;;  %v43_v22 = vld [vmem:[%s404_s2] sm:$0x3]  ;;  %v32_v23 = vrot.slane %v27_v17, %v31_v11  ;;  %v36_v24 = vrot.slane %v27_v17, %v35_v13  ;;  %v301_v44 = vld [vmem:[%s401_s3 + $0x38] sm:$0xff]  }
   0x8   :  { %268 = vmatprep.subr.bf16.mxu0 %v290_v4  ;;  %v48_v25 = vrot.slane %v43_v22, %v31_v11  ;;  %v52_v26 = vrot.slane %v43_v22, %v35_v13  ;;  %v247_v47 = vld [vmem:[%s405_s4] ss:$0 sm:$0xff] }
   0x9   :  { %v40_v29 = vmul.f32 %v36_v24, %v24_v19  ;;  %v42_v30 = vmul.f32 %v36_v24, %v26_v21  ;;  %v39_v31 = vmul.f32 %v32_v23, %v23_v18  ;;  %v41_v32 = vmul.f32 %v32_v23, %v25_v20 }
   0xb   :  { %269 = vmatpush3.bf16.msra.mxu0 %v291_v6  ;;  %v56_v33 = vadd.f32 %v52_v26, %v40_v29  ;;  %v58_v34 = vadd.f32 %v52_v26, %v42_v30  ;;  %v55_v35 = vadd.f32 %v48_v25, %v39_v31  ;;  %v57_v36 = vadd.f32 %v48_v25, %v41_v32 }
   0xc   :  { %270 = vmatprep.subr.bf16.mxu0 %v292_v7 }
   0xd   :  { %v60_v39 = vmax.f32 %v56_v33, 0.0  ;;  %v62_v40 = vmax.f32 %v58_v34, 0.0  ;;  %v59_v42 = vmax.f32 %v55_v35, 0.0  ;;  %v61_v43 = vmax.f32 %v57_v36, 0.0 }
   0xf   :  { %271 = vmatpush3.bf16.msra.mxu0 %v293_v9  ;;  %v64_v41 = vpack.c.bf16 %v62_v40, %v60_v39  ;;  %v63_v45 = vpack.c.bf16 %v61_v43, %v59_v42 }
  0x10   :  { %272 = vmatprep.subr.bf16.mxu0 %v294_v10 }
  0x11   :  { %232 = vmatprep.mubr.bf16.mxu0 %v64_v41 }
  0x13   :  { %273 = vmatpush3.bf16.msra.mxu0 %v295_v12 }
  0x14   :  { %274 = vmatprep.subr.bf16.mxu0 %v296_v14 }
  0x17   :  { %275 = vmatpush3.bf16.msra.mxu0 %v297_v27 }
  0x18   :  { %276 = vmatprep.subr.bf16.mxu0 %v298_v28 }
  0x1b   :  { %277 = vmatpush3.bf16.msra.mxu0 %v299_v37 }
  0x1c   :  { %278 = vmatprep.subr.bf16.mxu0 %v300_v38 }
  0x1f   :  { %279 = vmatpush3.bf16.msra.mxu0 %v301_v44 }
  0x22   :  { %233 = vmatmul.mubr.bf16.vlgmr.msra.gmra.mrb[0].mxu0 %v63_v45 }
  0xf5   :  { %v280_v46 = vpop.f32.mrb[0].mxu0 }
  0xf6   :  { %v281_v48 = vpop.f32.mrb[1].mxu0 }
  0xf7   :  { %v282_v49 = vadd.f32 %v281_v48, %v280_v46  ;;  %v283_v50 = vpop.f32.mrb[2].mxu0 }
  0xf8   :  { %v284_v51 = vpop.f32.mrb[3].mxu0 }
  0xf9   :  { %v235_v52 = vadd.f32 %v282_v49, %v247_v47  ;;  %v285_v53 = vadd.f32 %v284_v51, %v283_v50 }
  0xfb   :  { %241 = vst [vmem:[%s406_s5] sm:$0xff] %v235_v52  ;;  %v238_v54 = vadd.f32 %v285_v53, %v247_v47 }
  0xfd   :  { %242 = vst [vmem:[%s406_s5 + $0x8] sm:$0xff] %v238_v54 }

// kernel: res_classifier_forward.2
= control target key start
LH: loop header
LB: loop body
LE: loop exit
PB: predicated region body
PF: predicated region fallthrough
CT: control target
= control target key end

     0   :  { %s3661_s1 = inlined_call_operand.vmem [shape: bf16[2048,256], index: 1, kind: input, shape index: {}]   ;;  %s3662_s0 = inlined_call_operand.vmem [shape: f32[16,2048], index: 0, kind: input, shape index: {}]   ;;  %s3663_s2 = inlined_call_operand.vmem [shape: f32[1,256], index: 2, kind: input, shape index: {}]   ;;  %s3664_s3 = inlined_call_operand.vmem [shape: bf16[16,256], index: 3, kind: output, shape index: {0}]   ;;  %s3665_s4 = inlined_call_operand.vmem [shape: f32[1,1,256], index: 4, kind: output, shape index: {1}]   ;;  %s3666_s5 = inlined_call_operand.vmem [shape: f32[1,1,256], index: 5, kind: output, shape index: {2}]  }
   0x1   :  { %v2367_v0 = vld [vmem:[%s3661_s1 + $0x4] ss:$8 sps:$4 sm:$0xff]   ;;  %v2371_v2 = vld [vmem:[%s3661_s1] ss:$8 sps:$4 sm:$0xff]   ;;  %v2373_v4 = vld [vmem:[%s3661_s1 + $0x14] ss:$8 sps:$4 sm:$0xff]  }
   0x2   :  { %v2369_v1 = vld [vmem:[%s3661_s1 + $0x404] ss:$8 sps:$4 sm:$0xff]   ;;  %1613 = vmatprep.subr.bf16.mxu1 %v2367_v0  ;;  %v2372_v3 = vld [vmem:[%s3661_s1 + $0x400] ss:$8 sps:$4 sm:$0xff]   ;;  %v2375_v5 = vld [vmem:[%s3661_s1 + $0x414] ss:$8 sps:$4 sm:$0xff]  }
   0x3   :  { %1785 = vmatprep.subr.bf16.mxu0 %v2369_v1  ;;  %1614 = vmatpush1.bf16.msra.mxu1 %v2371_v2  ;;  %v2377_v6 = vld [vmem:[%s3661_s1 + $0x10] ss:$8 sps:$4 sm:$0xff]   ;;  %v2379_v8 = vld [vmem:[%s3661_s1 + $0x24] ss:$8 sps:$4 sm:$0xff]   ;;  %v2383_v10 = vld [vmem:[%s3661_s1 + $0x20] ss:$8 sps:$4 sm:$0xff]  }
   0x4   :  { %1786 = vmatpush1.bf16.msra.mxu0 %v2372_v3  ;;  %1615 = vmatprep.subr.bf16.mxu1 %v2373_v4  ;;  %v2378_v7 = vld [vmem:[%s3661_s1 + $0x410] ss:$8 sps:$4 sm:$0xff]   ;;  %v2381_v9 = vld [vmem:[%s3661_s1 + $0x424] ss:$8 sps:$4 sm:$0xff]   ;;  %v2384_v11 = vld [vmem:[%s3661_s1 + $0x420] ss:$8 sps:$4 sm:$0xff]  }
   0x5   :  { %1787 = vmatprep.subr.bf16.mxu0 %v2375_v5  ;;  %v2385_v12 = vld [vmem:[%s3661_s1 + $0x34] ss:$8 sps:$4 sm:$0xff]   ;;  %v2389_v14 = vld [vmem:[%s3661_s1 + $0x30] ss:$8 sps:$4 sm:$0xff]   ;;  %v2391_v16 = vld [vmem:[%s3661_s1 + $0x44] ss:$8 sps:$4 sm:$0xff]  }
   0x6   :  { %v2387_v13 = vld [vmem:[%s3661_s1 + $0x434] ss:$8 sps:$4 sm:$0xff]   ;;  %v2390_v15 = vld [vmem:[%s3661_s1 + $0x430] ss:$8 sps:$4 sm:$0xff]   ;;  %v2393_v17 = vld [vmem:[%s3661_s1 + $0x444] ss:$8 sps:$4 sm:$0xff]  }
   0x7   :  { %1616 = vmatpush1.bf16.msra.mxu1 %v2377_v6  ;;  %v2395_v18 = vld [vmem:[%s3661_s1 + $0x40] ss:$8 sps:$4 sm:$0xff]   ;;  %v2397_v20 = vld [vmem:[%s3661_s1 + $0x54] ss:$8 sps:$4 sm:$0xff]   ;;  %v2401_v22 = vld [vmem:[%s3661_s1 + $0x50] ss:$8 sps:$4 sm:$0xff]  }
   0x8   :  { %1788 = vmatpush1.bf16.msra.mxu0 %v2378_v7  ;;  %1617 = vmatprep.subr.bf16.mxu1 %v2379_v8  ;;  %v2396_v19 = vld [vmem:[%s3661_s1 + $0x440] ss:$8 sps:$4 sm:$0xff]   ;;  %v2399_v21 = vld [vmem:[%s3661_s1 + $0x454] ss:$8 sps:$4 sm:$0xff]   ;;  %v2402_v23 = vld [vmem:[%s3661_s1 + $0x450] ss:$8 sps:$4 sm:$0xff]  }
   0x9   :  { %1789 = vmatprep.subr.bf16.mxu0 %v2381_v9  ;;  %v2403_v24 = vld [vmem:[%s3661_s1 + $0x64] ss:$8 sps:$4 sm:$0xff]   ;;  %v2407_v26 = vld [vmem:[%s3661_s1 + $0x60] ss:$8 sps:$4 sm:$0xff]   ;;  %v2409_v28 = vld [vmem:[%s3661_s1 + $0x74] ss:$8 sps:$4 sm:$0xff]  }
   0xa   :  { %v2405_v25 = vld [vmem:[%s3661_s1 + $0x464] ss:$8 sps:$4 sm:$0xff]   ;;  %v2408_v27 = vld [vmem:[%s3661_s1 + $0x460] ss:$8 sps:$4 sm:$0xff]   ;;  %v2411_v29 = vld [vmem:[%s3661_s1 + $0x474] ss:$8 sps:$4 sm:$0xff]  }
   0xb   :  { %1618 = vmatpush1.bf16.msra.mxu1 %v2383_v10  ;;  %v2413_v30 = vld [vmem:[%s3661_s1 + $0x70] ss:$8 sps:$4 sm:$0xff]   ;;  %v2415_v32 = vld [vmem:[%s3661_s1 + $0x84] ss:$8 sps:$4 sm:$0xff]   ;;  %v2419_v34 = vld [vmem:[%s3661_s1 + $0x80] ss:$8 sps:$4 sm:$0xff]  }
   0xc   :  { %1790 = vmatpush1.bf16.msra.mxu0 %v2384_v11  ;;  %1619 = vmatprep.subr.bf16.mxu1 %v2385_v12  ;;  %v2414_v31 = vld [vmem:[%s3661_s1 + $0x470] ss:$8 sps:$4 sm:$0xff]   ;;  %v2417_v33 = vld [vmem:[%s3661_s1 + $0x484] ss:$8 sps:$4 sm:$0xff]   ;;  %v2420_v35 = vld [vmem:[%s3661_s1 + $0x480] ss:$8 sps:$4 sm:$0xff]  }
   0xd   :  { %1791 = vmatprep.subr.bf16.mxu0 %v2387_v13  ;;  %v2421_v36 = vld [vmem:[%s3661_s1 + $0x94] ss:$8 sps:$4 sm:$0xff]   ;;  %v2425_v38 = vld [vmem:[%s3661_s1 + $0x90] ss:$8 sps:$4 sm:$0xff]   ;;  %v2427_v40 = vld [vmem:[%s3661_s1 + $0xa4] ss:$8 sps:$4 sm:$0xff]  }
   0xe   :  { %v2423_v37 = vld [vmem:[%s3661_s1 + $0x494] ss:$8 sps:$4 sm:$0xff]   ;;  %v2426_v39 = vld [vmem:[%s3661_s1 + $0x490] ss:$8 sps:$4 sm:$0xff]   ;;  %v2429_v41 = vld [vmem:[%s3661_s1 + $0x4a4] ss:$8 sps:$4 sm:$0xff]  }
   0xf   :  { %1620 = vmatpush1.bf16.msra.mxu1 %v2389_v14  ;;  %v2431_v42 = vld [vmem:[%s3661_s1 + $0xa0] ss:$8 sps:$4 sm:$0xff]   ;;  %v2433_v44 = vld [vmem:[%s3661_s1 + $0xb4] ss:$8 sps:$4 sm:$0xff]   ;;  %v2437_v46 = vld [vmem:[%s3661_s1 + $0xb0] ss:$8 sps:$4 sm:$0xff]  }
  0x10   :  { %1792 = vmatpush1.bf16.msra.mxu0 %v2390_v15  ;;  %1621 = vmatprep.subr.bf16.mxu1 %v2391_v16  ;;  %v2432_v43 = vld [vmem:[%s3661_s1 + $0x4a0] ss:$8 sps:$4 sm:$0xff]   ;;  %v2435_v45 = vld [vmem:[%s3661_s1 + $0x4b4] ss:$8 sps:$4 sm:$0xff]   ;;  %v2438_v47 = vld [vmem:[%s3661_s1 + $0x4b0] ss:$8 sps:$4 sm:$0xff]  }
  0x11   :  { %1793 = vmatprep.subr.bf16.mxu0 %v2393_v17  ;;  %v18_v48 = vld [vmem:[%s3662_s0 + $0x8] sm:$0xff]  ;;  %v2445_v58 = vld [vmem:[%s3661_s1 + $0xd4] ss:$8 sps:$4 sm:$0xff]   ;;  %v2449_v60 = vld [vmem:[%s3661_s1 + $0xd0] ss:$8 sps:$4 sm:$0xff]  }
  0x12   :  { %v34_v49 = vld [vmem:[%s3662_s0 + $0x88] sm:$0xff]  ;;  %v2447_v59 = vld [vmem:[%s3661_s1 + $0x4d4] ss:$8 sps:$4 sm:$0xff]   ;;  %v2450_v61 = vld [vmem:[%s3661_s1 + $0x4d0] ss:$8 sps:$4 sm:$0xff]  }
  0x13   :  { %1622 = vmatpush1.bf16.msra.mxu1 %v2395_v18  ;;  %v2439_v50 = vld [vmem:[%s3661_s1 + $0xc4] ss:$8 sps:$4 sm:$0xff]   ;;  %v50_v52 = vpack.c.bf16 %v34_v49, %v18_v48  ;;  %v2443_v56 = vld [vmem:[%s3661_s1 + $0xc0] ss:$8 sps:$4 sm:$0xff]   ;;  %v2457_v2 = vld [vmem:[%s3661_s1 + $0xf4] ss:$8 sps:$4 sm:$0xff]  }
  0x14   :  { %1794 = vmatpush1.bf16.msra.mxu0 %v2396_v19  ;;  %1623 = vmatprep.subr.bf16.mxu1 %v2397_v20  ;;  %v2441_v51 = vld [vmem:[%s3661_s1 + $0x4c4] ss:$8 sps:$4 sm:$0xff]   ;;  %v2444_v57 = vld [vmem:[%s3661_s1 + $0x4c0] ss:$8 sps:$4 sm:$0xff]   ;;  %v2459_v3 = vld [vmem:[%s3661_s1 + $0x4f4] ss:$8 sps:$4 sm:$0xff]  }
  0x15   :  { %1795 = vmatprep.subr.bf16.mxu0 %v2399_v21  ;;  %v26_v53 = vld [vmem:[%s3662_s0 + $0x48] sm:$0xff]  ;;  %1645 = vmatprep.mubr.bf16.mxu1 %v50_v52  ;;  %v2461_v4 = vld [vmem:[%s3661_s1 + $0xf0] ss:$8 sps:$4 sm:$0xff]   ;;  %v17_v6 = vld [vmem:[%s3662_s0] sm:$0xff] }
  0x16   :  { %v42_v54 = vld [vmem:[%s3662_s0 + $0xc8] sm:$0xff]  ;;  %v2462_v5 = vld [vmem:[%s3661_s1 + $0x4f0] ss:$8 sps:$4 sm:$0xff]   ;;  %v33_v8 = vld [vmem:[%s3662_s0 + $0x80] sm:$0xff] }
  0x17   :  { %1624 = vmatpush1.bf16.msra.mxu1 %v2401_v22  ;;  %v58_v55 = vpack.c.bf16 %v42_v54, %v26_v53  ;;  %v2451_v62 = vld [vmem:[%s3661_s1 + $0xe4] ss:$8 sps:$4 sm:$0xff]   ;;  %v2455_v0 = vld [vmem:[%s3661_s1 + $0xe0] ss:$8 sps:$4 sm:$0xff]   ;;  %v49_v14 = vpack.c.bf16 %v33_v8, %v17_v6  ;;  %v2471_v16 = vld [vmem:[%s3661_s1 + $0x114] ss:$8 sps:$4 sm:$0xff]  }
  0x18   :  { %1796 = vmatpush1.bf16.msra.mxu0 %v2402_v23  ;;  %1625 = vmatprep.subr.bf16.mxu1 %v2403_v24  ;;  %v2453_v63 = vld [vmem:[%s3661_s1 + $0x4e4] ss:$8 sps:$4 sm:$0xff]   ;;  %v2456_v1 = vld [vmem:[%s3661_s1 + $0x4e0] ss:$8 sps:$4 sm:$0xff]   ;;  %v2474_v17 = vld [vmem:[%s3661_s1 + $0x514] ss:$8 sps:$4 sm:$0xff]  }
  0x19   :  { %1797 = vmatprep.subr.bf16.mxu0 %v2405_v25  ;;  %1817 = vmatprep.mubr.bf16.mxu0 %v58_v55  ;;  %v2465_v7 = vld [vmem:[%s3661_s1 + $0x104] ss:$8 sps:$4 sm:$0xff]   ;;  %v2463_v12 = vld [vmem:[%s3661_s1 + $0x100] ss:$8 sps:$4 sm:$0xff]   ;;  %v2469_v18 = vld [vmem:[%s3661_s1 + $0x110] ss:$8 sps:$4 sm:$0xff]  }
  0x1a   :  { %v25_v9 = vld [vmem:[%s3662_s0 + $0x40] sm:$0xff]  ;;  %v2472_v19 = vld [vmem:[%s3661_s1 + $0x510] ss:$8 sps:$4 sm:$0xff]   ;;  %v2483_v24 = vld [vmem:[%s3661_s1 + $0x134] ss:$8 sps:$4 sm:$0xff]  }
  0x1b   :  { %1626 = vmatpush1.bf16.msra.mxu1 %v2407_v26  ;;  %v41_v10 = vld [vmem:[%s3662_s0 + $0xc0] sm:$0xff]  ;;  %v2486_v25 = vld [vmem:[%s3661_s1 + $0x534] ss:$8 sps:$4 sm:$0xff]   ;;  %v2481_v26 = vld [vmem:[%s3661_s1 + $0x130] ss:$8 sps:$4 sm:$0xff]  }
  0x1c   :  { %1798 = vmatpush1.bf16.msra.mxu0 %v2408_v27  ;;  %1627 = vmatprep.subr.bf16.mxu1 %v2409_v28  ;;  %v2468_v11 = vld [vmem:[%s3661_s1 + $0x504] ss:$8 sps:$4 sm:$0xff]   ;;  %v2466_v13 = vld [vmem:[%s3661_s1 + $0x500] ss:$8 sps:$4 sm:$0xff]   ;;  %v57_v15 = vpack.c.bf16 %v41_v10, %v25_v9  ;;  %v2484_v27 = vld [vmem:[%s3661_s1 + $0x530] ss:$8 sps:$4 sm:$0xff]  }
  0x1d   :  { %1799 = vmatprep.subr.bf16.mxu0 %v2411_v29  ;;  %v2477_v20 = vld [vmem:[%s3661_s1 + $0x124] ss:$8 sps:$4 sm:$0xff]   ;;  %v2475_v22 = vld [vmem:[%s3661_s1 + $0x120] ss:$8 sps:$4 sm:$0xff]   ;;  %v2505_v48 = vld [vmem:[%s3661_s1 + $0x170] ss:$8 sps:$4 sm:$0xff]  }
  0x1e   :  { %v2480_v21 = vld [vmem:[%s3661_s1 + $0x524] ss:$8 sps:$4 sm:$0xff]   ;;  %v2478_v23 = vld [vmem:[%s3661_s1 + $0x520] ss:$8 sps:$4 sm:$0xff]   ;;  %v2508_v49 = vld [vmem:[%s3661_s1 + $0x570] ss:$8 sps:$4 sm:$0xff]  }
  0x1f   :  { %1628 = vmatpush1.bf16.msra.mxu1 %v2413_v30  ;;  %v2489_v28 = vld [vmem:[%s3661_s1 + $0x144] ss:$8 sps:$4 sm:$0xff]   ;;  %v2487_v30 = vld [vmem:[%s3661_s1 + $0x140] ss:$8 sps:$4 sm:$0xff]   ;;  %v2519_v54 = vld [vmem:[%s3661_s1 + $0x194] ss:$8 sps:$4 sm:$0xff]  }
  0x20   :  { %1800 = vmatpush1.bf16.msra.mxu0 %v2414_v31  ;;  %1629 = vmatprep.subr.bf16.mxu1 %v2415_v32  ;;  %v2492_v29 = vld [vmem:[%s3661_s1 + $0x544] ss:$8 sps:$4 sm:$0xff]   ;;  %v2490_v31 = vld [vmem:[%s3661_s1 + $0x540] ss:$8 sps:$4 sm:$0xff]   ;;  %v2495_v32 = vld [vmem:[%s3661_s1 + $0x154] ss:$8 sps:$4 sm:$0xff]  }
  0x21   :  { %1801 = vmatprep.subr.bf16.mxu0 %v2417_v33  ;;  %v2498_v33 = vld [vmem:[%s3661_s1 + $0x554] ss:$8 sps:$4 sm:$0xff]   ;;  %v2511_v52 = vld [vmem:[%s3661_s1 + $0x180] ss:$8 sps:$4 sm:$0xff]   ;;  %v2541_v8 = vld [vmem:[%s3661_s1 + $0x1d0] ss:$8 sps:$4 sm:$0xff]  }
  0x22   :  { %v2514_v53 = vld [vmem:[%s3661_s1 + $0x580] ss:$8 sps:$4 sm:$0xff]   ;;  %v2522_v55 = vld [vmem:[%s3661_s1 + $0x594] ss:$8 sps:$4 sm:$0xff]   ;;  %v2544_v9 = vld [vmem:[%s3661_s1 + $0x5d0] ss:$8 sps:$4 sm:$0xff]  }
  0x23   :  { %1630 = vmatpush1.bf16.msra.mxu1 %v2419_v34  ;;  %v2493_v34 = vld [vmem:[%s3661_s1 + $0x150] ss:$8 sps:$4 sm:$0xff]   ;;  %v2543_v6 = vld [vmem:[%s3661_s1 + $0x1d4] ss:$8 sps:$4 sm:$0xff]   ;;  %v2549_v10 = vld [vmem:[%s3661_s1 + $0x1e4] ss:$8 sps:$4 sm:$0xff]  }
  0x24   :  { %1802 = vmatpush1.bf16.msra.mxu0 %v2420_v35  ;;  %1631 = vmatprep.subr.bf16.mxu1 %v2421_v36  ;;  %v2496_v35 = vld [vmem:[%s3661_s1 + $0x550] ss:$8 sps:$4 sm:$0xff]   ;;  %v2501_v36 = vld [vmem:[%s3661_s1 + $0x164] ss:$8 sps:$4 sm:$0xff]  }
  0x25   :  { %1803 = vmatprep.subr.bf16.mxu0 %v2423_v37  ;;  %v2504_v37 = vld [vmem:[%s3661_s1 + $0x564] ss:$8 sps:$4 sm:$0xff]  }
  0x27   :  { %1632 = vmatpush1.bf16.msra.mxu1 %v2425_v38  ;;  %v2499_v38 = vld [vmem:[%s3661_s1 + $0x160] ss:$8 sps:$4 sm:$0xff]  }
  0x28   :  { %1804 = vmatpush1.bf16.msra.mxu0 %v2426_v39  ;;  %1633 = vmatprep.subr.bf16.mxu1 %v2427_v40  ;;  %v2502_v39 = vld [vmem:[%s3661_s1 + $0x560] ss:$8 sps:$4 sm:$0xff]   ;;  %v20_v40 = vld [vmem:[%s3662_s0 + $0x18] sm:$0xff] }
  0x29   :  { %1805 = vmatprep.subr.bf16.mxu0 %v2429_v41  ;;  %v36_v41 = vld [vmem:[%s3662_s0 + $0x98] sm:$0xff] }
  0x2b   :  { %1634 = vmatpush1.bf16.msra.mxu1 %v2431_v42  ;;  %v2507_v42 = vld [vmem:[%s3661_s1 + $0x174] ss:$8 sps:$4 sm:$0xff]  }
  0x2c   :  { %1806 = vmatpush1.bf16.msra.mxu0 %v2432_v43  ;;  %1635 = vmatprep.subr.bf16.mxu1 %v2433_v44  ;;  %v2510_v43 = vld [vmem:[%s3661_s1 + $0x574] ss:$8 sps:$4 sm:$0xff]   ;;  %v52_v44 = vpack.c.bf16 %v36_v41, %v20_v40  ;;  %v2574_v40 = vld [vmem:[%s3661_s1 + $0x620] ss:$8 sps:$4 sm:$0xff]  }
  0x2d   :  { %1807 = vmatprep.subr.bf16.mxu0 %v2435_v45  ;;  %v28_v45 = vld [vmem:[%s3662_s0 + $0x58] sm:$0xff] }
  0x2f   :  { %1636 = vmatpush1.bf16.msra.mxu1 %v2437_v46  ;;  %v44_v46 = vld [vmem:[%s3662_s0 + $0xd8] sm:$0xff] }
  0x30   :  { %1808 = vmatpush1.bf16.msra.mxu0 %v2438_v47  ;;  %1637 = vmatprep.subr.bf16.mxu1 %v2439_v50  ;;  %v60_v47 = vpack.c.bf16 %v44_v46, %v28_v45  ;;  %v2513_v50 = vld [vmem:[%s3661_s1 + $0x184] ss:$8 sps:$4 sm:$0xff]   ;;  %v2580_v45 = vld [vmem:[%s3661_s1 + $0x630] ss:$8 sps:$4 sm:$0xff]  }
  0x31   :  { %1809 = vmatprep.subr.bf16.mxu0 %v2441_v51  ;;  %v2516_v51 = vld [vmem:[%s3661_s1 + $0x584] ss:$8 sps:$4 sm:$0xff]  }
  0x32   :  { %v2585_v46 = vld [vmem:[%s3661_s1 + $0x244] ss:$8 sps:$4 sm:$0xff]  }
  0x33   :  { %1638 = vmatpush1.bf16.msra.mxu1 %v2443_v56  ;;  %v2517_v56 = vld [vmem:[%s3661_s1 + $0x190] ss:$8 sps:$4 sm:$0xff]  }
  0x34   :  { %1810 = vmatpush1.bf16.msra.mxu0 %v2444_v57  ;;  %1639 = vmatprep.subr.bf16.mxu1 %v2445_v58  ;;  %v2520_v57 = vld [vmem:[%s3661_s1 + $0x590] ss:$8 sps:$4 sm:$0xff]   ;;  %v2525_v58 = vld [vmem:[%s3661_s1 + $0x1a4] ss:$8 sps:$4 sm:$0xff]  }
  0x35   :  { %1811 = vmatprep.subr.bf16.mxu0 %v2447_v59  ;;  %v2528_v59 = vld [vmem:[%s3661_s1 + $0x5a4] ss:$8 sps:$4 sm:$0xff]  }
  0x37   :  { %1640 = vmatpush1.bf16.msra.mxu1 %v2449_v60  ;;  %v2523_v60 = vld [vmem:[%s3661_s1 + $0x1a0] ss:$8 sps:$4 sm:$0xff]  }
  0x38   :  { %1812 = vmatpush1.bf16.msra.mxu0 %v2450_v61  ;;  %1641 = vmatprep.subr.bf16.mxu1 %v2451_v62  ;;  %v2526_v61 = vld [vmem:[%s3661_s1 + $0x5a0] ss:$8 sps:$4 sm:$0xff]   ;;  %v2531_v62 = vld [vmem:[%s3661_s1 + $0x1b4] ss:$8 sps:$4 sm:$0xff]  }
  0x39   :  { %1813 = vmatprep.subr.bf16.mxu0 %v2453_v63  ;;  %v2534_v63 = vld [vmem:[%s3661_s1 + $0x5b4] ss:$8 sps:$4 sm:$0xff]  }
  0x3b   :  { %1642 = vmatpush1.bf16.msra.mxu1 %v2455_v0  ;;  %v2529_v0 = vld [vmem:[%s3661_s1 + $0x1b0] ss:$8 sps:$4 sm:$0xff]  }
  0x3c   :  { %1814 = vmatpush1.bf16.msra.mxu0 %v2456_v1  ;;  %1643 = vmatprep.subr.bf16.mxu1 %v2457_v2  ;;  %v2532_v1 = vld [vmem:[%s3661_s1 + $0x5b0] ss:$8 sps:$4 sm:$0xff]   ;;  %v2537_v2 = vld [vmem:[%s3661_s1 + $0x1c4] ss:$8 sps:$4 sm:$0xff]  }
  0x3d   :  { %1815 = vmatprep.subr.bf16.mxu0 %v2459_v3  ;;  %v2540_v3 = vld [vmem:[%s3661_s1 + $0x5c4] ss:$8 sps:$4 sm:$0xff]  }
  0x3f   :  { %1644 = vmatpush1.bf16.msra.mxu1 %v2461_v4  ;;  %v2535_v4 = vld [vmem:[%s3661_s1 + $0x1c0] ss:$8 sps:$4 sm:$0xff]  }
  0x40   :  { %1816 = vmatpush1.bf16.msra.mxu0 %v2462_v5  ;;  %1656 = vmatprep.subr.bf16.mxu1 %v2465_v7  ;;  %v2538_v5 = vld [vmem:[%s3661_s1 + $0x5c0] ss:$8 sps:$4 sm:$0xff]   ;;  %v2546_v7 = vld [vmem:[%s3661_s1 + $0x5d4] ss:$8 sps:$4 sm:$0xff]  }
  0x41   :  { %1828 = vmatprep.subr.bf16.mxu0 %v2468_v11  ;;  %v2552_v11 = vld [vmem:[%s3661_s1 + $0x5e4] ss:$8 sps:$4 sm:$0xff]  }
  0x42   :  { %1646 = vmatmul.mubr.bf16.vlgmr.msra.gmra.mrb[0].mxu1 %v49_v14  ;;  %v2555_v14 = vld [vmem:[%s3661_s1 + $0x1f4] ss:$8 sps:$4 sm:$0xff]  }
  0x43   :  { %1818 = vmatmul.mubr.bf16.vlgmr.msra.gmra.mrb[0].mxu0 %v57_v15  ;;  %1657 = vmatpush1.bf16.msra.mxu1 %v2463_v12  ;;  %v2547_v12 = vld [vmem:[%s3661_s1 + $0x1e0] ss:$8 sps:$4 sm:$0xff]   ;;  %v2558_v15 = vld [vmem:[%s3661_s1 + $0x5f4] ss:$8 sps:$4 sm:$0xff]  }
  0x44   :  { %1829 = vmatpush1.bf16.msra.mxu0 %v2466_v13  ;;  %1658 = vmatprep.subr.bf16.mxu1 %v2471_v16  ;;  %v2550_v13 = vld [vmem:[%s3661_s1 + $0x5e0] ss:$8 sps:$4 sm:$0xff]   ;;  %v2553_v16 = vld [vmem:[%s3661_s1 + $0x1f0] ss:$8 sps:$4 sm:$0xff]  }
  0x45   :  { %1830 = vmatprep.subr.bf16.mxu0 %v2474_v17  ;;  %1688 = vmatprep.mubr.bf16.mxu1 %v52_v44  ;;  %v2556_v17 = vld [vmem:[%s3661_s1 + $0x5f0] ss:$8 sps:$4 sm:$0xff]  }
  0x46   :  { %1860 = vmatprep.mubr.bf16.mxu0 %v60_v47  ;;  %v2577_v44 = vld [vmem:[%s3661_s1 + $0x230] ss:$8 sps:$4 sm:$0xff]   ;;  %v2588_v47 = vld [vmem:[%s3661_s1 + $0x644] ss:$8 sps:$4 sm:$0xff]  }
  0x47   :  { %1659 = vmatpush1.bf16.msra.mxu1 %v2469_v18  ;;  %v19_v18 = vld [vmem:[%s3662_s0 + $0x10] sm:$0xff] }
  0x48   :  { %1831 = vmatpush1.bf16.msra.mxu0 %v2472_v19  ;;  %1660 = vmatprep.subr.bf16.mxu1 %v2477_v20  ;;  %v2561_v19 = vld [vmem:[%s3661_s1 + $0x204] ss:$8 sps:$4 sm:$0xff]   ;;  %v35_v20 = vld [vmem:[%s3662_s0 + $0x90] sm:$0xff] }
  0x49   :  { %1832 = vmatprep.subr.bf16.mxu0 %v2480_v21  ;;  %v27_v21 = vld [vmem:[%s3662_s0 + $0x50] sm:$0xff] }
  0x4b   :  { %1661 = vmatpush1.bf16.msra.mxu1 %v2475_v22  ;;  %v43_v22 = vld [vmem:[%s3662_s0 + $0xd0] sm:$0xff] }
  0x4c   :  { %1833 = vmatpush1.bf16.msra.mxu0 %v2478_v23  ;;  %1662 = vmatprep.subr.bf16.mxu1 %v2483_v24  ;;  %v2564_v23 = vld [vmem:[%s3661_s1 + $0x604] ss:$8 sps:$4 sm:$0xff]   ;;  %v2559_v24 = vld [vmem:[%s3661_s1 + $0x200] ss:$8 sps:$4 sm:$0xff]  }
  0x4d   :  { %1834 = vmatprep.subr.bf16.mxu0 %v2486_v25  ;;  %v2562_v25 = vld [vmem:[%s3661_s1 + $0x600] ss:$8 sps:$4 sm:$0xff]  }
  0x4f   :  { %1663 = vmatpush1.bf16.msra.mxu1 %v2481_v26  ;;  %v51_v26 = vpack.c.bf16 %v35_v20, %v19_v18  ;;  %v2639_v18 = vld [vmem:[%s3661_s1 + $0x2d4] ss:$8 sps:$4 sm:$0xff]   ;;  %v2637_v20 = vld [vmem:[%s3661_s1 + $0x2d0] ss:$8 sps:$4 sm:$0xff]  }
  0x50   :  { %1835 = vmatpush1.bf16.msra.mxu0 %v2484_v27  ;;  %1664 = vmatprep.subr.bf16.mxu1 %v2489_v28  ;;  %v59_v27 = vpack.c.bf16 %v43_v22, %v27_v21  ;;  %v2567_v28 = vld [vmem:[%s3661_s1 + $0x214] ss:$8 sps:$4 sm:$0xff]   ;;  %v2640_v21 = vld [vmem:[%s3661_s1 + $0x6d0] ss:$8 sps:$4 sm:$0xff]   ;;  %v2645_v22 = vld [vmem:[%s3661_s1 + $0x2e4] ss:$8 sps:$4 sm:$0xff]  }
  0x51   :  { %1836 = vmatprep.subr.bf16.mxu0 %v2492_v29  ;;  %v2570_v29 = vld [vmem:[%s3661_s1 + $0x614] ss:$8 sps:$4 sm:$0xff]  }
  0x53   :  { %1665 = vmatpush1.bf16.msra.mxu1 %v2487_v30  ;;  %v2565_v30 = vld [vmem:[%s3661_s1 + $0x210] ss:$8 sps:$4 sm:$0xff]  }
  0x54   :  { %1837 = vmatpush1.bf16.msra.mxu0 %v2490_v31  ;;  %1666 = vmatprep.subr.bf16.mxu1 %v2495_v32  ;;  %v2568_v31 = vld [vmem:[%s3661_s1 + $0x610] ss:$8 sps:$4 sm:$0xff]   ;;  %v2573_v32 = vld [vmem:[%s3661_s1 + $0x224] ss:$8 sps:$4 sm:$0xff]  }
  0x55   :  { %1838 = vmatprep.subr.bf16.mxu0 %v2498_v33  ;;  %v2576_v33 = vld [vmem:[%s3661_s1 + $0x624] ss:$8 sps:$4 sm:$0xff]  }
  0x57   :  { %1667 = vmatpush1.bf16.msra.mxu1 %v2493_v34  ;;  %v22_v34 = vld [vmem:[%s3662_s0 + $0x28] sm:$0xff] }
  0x58   :  { %1839 = vmatpush1.bf16.msra.mxu0 %v2496_v35  ;;  %1668 = vmatprep.subr.bf16.mxu1 %v2501_v36  ;;  %v38_v35 = vld [vmem:[%s3662_s0 + $0xa8] sm:$0xff] }
  0x59   :  { %1840 = vmatprep.subr.bf16.mxu0 %v2504_v37  ;;  %v54_v36 = vpack.c.bf16 %v38_v35, %v22_v34  ;;  %v2571_v37 = vld [vmem:[%s3661_s1 + $0x220] ss:$8 sps:$4 sm:$0xff]   ;;  %v2657_v34 = vld [vmem:[%s3661_s1 + $0x304] ss:$8 sps:$4 sm:$0xff]  }
  0x5a   :  { %v2660_v35 = vld [vmem:[%s3661_s1 + $0x704] ss:$8 sps:$4 sm:$0xff]  }
  0x5b   :  { %1669 = vmatpush1.bf16.msra.mxu1 %v2499_v38  ;;  %v30_v38 = vld [vmem:[%s3662_s0 + $0x68] sm:$0xff] }
  0x5c   :  { %1841 = vmatpush1.bf16.msra.mxu0 %v2502_v39  ;;  %1670 = vmatprep.subr.bf16.mxu1 %v2507_v42  ;;  %v46_v39 = vld [vmem:[%s3662_s0 + $0xe8] sm:$0xff]  ;;  %v2579_v42 = vld [vmem:[%s3661_s1 + $0x234] ss:$8 sps:$4 sm:$0xff]  }
  0x5d   :  { %1842 = vmatprep.subr.bf16.mxu0 %v2510_v43  ;;  %v62_v41 = vpack.c.bf16 %v46_v39, %v30_v38  ;;  %v2582_v43 = vld [vmem:[%s3661_s1 + $0x634] ss:$8 sps:$4 sm:$0xff]  }
  0x5e   :  { %v40_v39 = vld [vmem:[%s3662_s0 + $0xb8] sm:$0xff] }
  0x5f   :  { %1671 = vmatpush1.bf16.msra.mxu1 %v2505_v48  ;;  %v2583_v48 = vld [vmem:[%s3661_s1 + $0x240] ss:$8 sps:$4 sm:$0xff]  }
  0x60   :  { %1843 = vmatpush1.bf16.msra.mxu0 %v2508_v49  ;;  %1672 = vmatprep.subr.bf16.mxu1 %v2513_v50  ;;  %v2586_v49 = vld [vmem:[%s3661_s1 + $0x640] ss:$8 sps:$4 sm:$0xff]   ;;  %v2591_v50 = vld [vmem:[%s3661_s1 + $0x254] ss:$8 sps:$4 sm:$0xff]  }
  0x61   :  { %1844 = vmatprep.subr.bf16.mxu0 %v2516_v51  ;;  %v2594_v51 = vld [vmem:[%s3661_s1 + $0x654] ss:$8 sps:$4 sm:$0xff]  }
  0x63   :  { %1673 = vmatpush1.bf16.msra.mxu1 %v2511_v52  ;;  %v2589_v52 = vld [vmem:[%s3661_s1 + $0x250] ss:$8 sps:$4 sm:$0xff]  }
  0x64   :  { %1845 = vmatpush1.bf16.msra.mxu0 %v2514_v53  ;;  %1674 = vmatprep.subr.bf16.mxu1 %v2519_v54  ;;  %v2592_v53 = vld [vmem:[%s3661_s1 + $0x650] ss:$8 sps:$4 sm:$0xff]   ;;  %v2597_v54 = vld [vmem:[%s3661_s1 + $0x264] ss:$8 sps:$4 sm:$0xff]  }
  0x65   :  { %1846 = vmatprep.subr.bf16.mxu0 %v2522_v55  ;;  %v2600_v55 = vld [vmem:[%s3661_s1 + $0x664] ss:$8 sps:$4 sm:$0xff]  }
  0x67   :  { %1675 = vmatpush1.bf16.msra.mxu1 %v2517_v56  ;;  %v2595_v56 = vld [vmem:[%s3661_s1 + $0x260] ss:$8 sps:$4 sm:$0xff]  }
  0x68   :  { %1847 = vmatpush1.bf16.msra.mxu0 %v2520_v57  ;;  %1676 = vmatprep.subr.bf16.mxu1 %v2525_v58  ;;  %v2598_v57 = vld [vmem:[%s3661_s1 + $0x660] ss:$8 sps:$4 sm:$0xff]   ;;  %v2603_v58 = vld [vmem:[%s3661_s1 + $0x274] ss:$8 sps:$4 sm:$0xff]  }
  0x69   :  { %1848 = vmatprep.subr.bf16.mxu0 %v2528_v59  ;;  %v2606_v59 = vld [vmem:[%s3661_s1 + $0x674] ss:$8 sps:$4 sm:$0xff]  }
  0x6b   :  { %1677 = vmatpush1.bf16.msra.mxu1 %v2523_v60  ;;  %v2601_v60 = vld [vmem:[%s3661_s1 + $0x270] ss:$8 sps:$4 sm:$0xff]  }
  0x6c   :  { %1849 = vmatpush1.bf16.msra.mxu0 %v2526_v61  ;;  %1678 = vmatprep.subr.bf16.mxu1 %v2531_v62  ;;  %v2604_v61 = vld [vmem:[%s3661_s1 + $0x670] ss:$8 sps:$4 sm:$0xff]   ;;  %v2609_v62 = vld [vmem:[%s3661_s1 + $0x284] ss:$8 sps:$4 sm:$0xff]  }
  0x6d   :  { %1850 = vmatprep.subr.bf16.mxu0 %v2534_v63  ;;  %v2612_v63 = vld [vmem:[%s3661_s1 + $0x684] ss:$8 sps:$4 sm:$0xff]  }
  0x6f   :  { %1679 = vmatpush1.bf16.msra.mxu1 %v2529_v0  ;;  %v2607_v0 = vld [vmem:[%s3661_s1 + $0x280] ss:$8 sps:$4 sm:$0xff]  }
  0x70   :  { %1851 = vmatpush1.bf16.msra.mxu0 %v2532_v1  ;;  %1680 = vmatprep.subr.bf16.mxu1 %v2537_v2  ;;  %v2610_v1 = vld [vmem:[%s3661_s1 + $0x680] ss:$8 sps:$4 sm:$0xff]   ;;  %v2615_v2 = vld [vmem:[%s3661_s1 + $0x294] ss:$8 sps:$4 sm:$0xff]  }
  0x71   :  { %1852 = vmatprep.subr.bf16.mxu0 %v2540_v3  ;;  %v2618_v3 = vld [vmem:[%s3661_s1 + $0x694] ss:$8 sps:$4 sm:$0xff]  }
  0x73   :  { %1681 = vmatpush1.bf16.msra.mxu1 %v2535_v4  ;;  %v2613_v4 = vld [vmem:[%s3661_s1 + $0x290] ss:$8 sps:$4 sm:$0xff]  }
  0x74   :  { %1853 = vmatpush1.bf16.msra.mxu0 %v2538_v5  ;;  %1682 = vmatprep.subr.bf16.mxu1 %v2543_v6  ;;  %v2616_v5 = vld [vmem:[%s3661_s1 + $0x690] ss:$8 sps:$4 sm:$0xff]   ;;  %v2621_v6 = vld [vmem:[%s3661_s1 + $0x2a4] ss:$8 sps:$4 sm:$0xff]  }
  0x75   :  { %1854 = vmatprep.subr.bf16.mxu0 %v2546_v7  ;;  %v2624_v7 = vld [vmem:[%s3661_s1 + $0x6a4] ss:$8 sps:$4 sm:$0xff]  }
  0x77   :  { %1683 = vmatpush1.bf16.msra.mxu1 %v2541_v8  ;;  %v2619_v8 = vld [vmem:[%s3661_s1 + $0x2a0] ss:$8 sps:$4 sm:$0xff]  }
  0x78   :  { %1855 = vmatpush1.bf16.msra.mxu0 %v2544_v9  ;;  %1684 = vmatprep.subr.bf16.mxu1 %v2549_v10  ;;  %v2622_v9 = vld [vmem:[%s3661_s1 + $0x6a0] ss:$8 sps:$4 sm:$0xff]   ;;  %v2627_v10 = vld [vmem:[%s3661_s1 + $0x2b4] ss:$8 sps:$4 sm:$0xff]  }
  0x79   :  { %1856 = vmatprep.subr.bf16.mxu0 %v2552_v11  ;;  %v2630_v11 = vld [vmem:[%s3661_s1 + $0x6b4] ss:$8 sps:$4 sm:$0xff]  }
  0x7b   :  { %1685 = vmatpush1.bf16.msra.mxu1 %v2547_v12  ;;  %v2625_v12 = vld [vmem:[%s3661_s1 + $0x2b0] ss:$8 sps:$4 sm:$0xff]  }
  0x7c   :  { %1857 = vmatpush1.bf16.msra.mxu0 %v2550_v13  ;;  %1686 = vmatprep.subr.bf16.mxu1 %v2555_v14  ;;  %v2628_v13 = vld [vmem:[%s3661_s1 + $0x6b0] ss:$8 sps:$4 sm:$0xff]   ;;  %v2633_v14 = vld [vmem:[%s3661_s1 + $0x2c4] ss:$8 sps:$4 sm:$0xff]  }
  0x7d   :  { %1858 = vmatprep.subr.bf16.mxu0 %v2558_v15  ;;  %v2636_v15 = vld [vmem:[%s3661_s1 + $0x6c4] ss:$8 sps:$4 sm:$0xff]  }
  0x7f   :  { %1687 = vmatpush1.bf16.msra.mxu1 %v2553_v16  ;;  %v2631_v16 = vld [vmem:[%s3661_s1 + $0x2c0] ss:$8 sps:$4 sm:$0xff]  }
  0x80   :  { %1859 = vmatpush1.bf16.msra.mxu0 %v2556_v17  ;;  %1699 = vmatprep.subr.bf16.mxu1 %v2561_v19  ;;  %v2634_v17 = vld [vmem:[%s3661_s1 + $0x6c0] ss:$8 sps:$4 sm:$0xff]   ;;  %v2642_v19 = vld [vmem:[%s3661_s1 + $0x6d4] ss:$8 sps:$4 sm:$0xff]  }
  0x81   :  { %1871 = vmatprep.subr.bf16.mxu0 %v2564_v23  ;;  %v2648_v23 = vld [vmem:[%s3661_s1 + $0x6e4] ss:$8 sps:$4 sm:$0xff]  }
  0x82   :  { %1689 = vmatmul.mubr.bf16.vlgmr.msra.gmra.mrb[0].mxu1 %v51_v26  ;;  %v2651_v26 = vld [vmem:[%s3661_s1 + $0x2f4] ss:$8 sps:$4 sm:$0xff]  }
  0x83   :  { %1861 = vmatmul.mubr.bf16.vlgmr.msra.gmra.mrb[0].mxu0 %v59_v27  ;;  %1700 = vmatpush1.bf16.msra.mxu1 %v2559_v24  ;;  %v2643_v24 = vld [vmem:[%s3661_s1 + $0x2e0] ss:$8 sps:$4 sm:$0xff]   ;;  %v2654_v27 = vld [vmem:[%s3661_s1 + $0x6f4] ss:$8 sps:$4 sm:$0xff]  }
  0x84   :  { %1872 = vmatpush1.bf16.msra.mxu0 %v2562_v25  ;;  %1701 = vmatprep.subr.bf16.mxu1 %v2567_v28  ;;  %v2646_v25 = vld [vmem:[%s3661_s1 + $0x6e0] ss:$8 sps:$4 sm:$0xff]   ;;  %v2649_v28 = vld [vmem:[%s3661_s1 + $0x2f0] ss:$8 sps:$4 sm:$0xff]  }
  0x85   :  { %1873 = vmatprep.subr.bf16.mxu0 %v2570_v29  ;;  %1731 = vmatprep.mubr.bf16.mxu1 %v54_v36  ;;  %v2652_v29 = vld [vmem:[%s3661_s1 + $0x6f0] ss:$8 sps:$4 sm:$0xff]  }
  0x86   :  { %1903 = vmatprep.mubr.bf16.mxu0 %v62_v41  ;;  %v24_v36 = vld [vmem:[%s3662_s0 + $0x38] sm:$0xff] }
  0x87   :  { %1702 = vmatpush1.bf16.msra.mxu1 %v2565_v30  ;;  %v21_v30 = vld [vmem:[%s3662_s0 + $0x20] sm:$0xff]  ;;  %v48_v41 = vld [vmem:[%s3662_s0 + $0xf8] sm:$0xff] }
  0x88   :  { %1874 = vmatpush1.bf16.msra.mxu0 %v2568_v31  ;;  %1703 = vmatprep.subr.bf16.mxu1 %v2573_v32  ;;  %v37_v31 = vld [vmem:[%s3662_s0 + $0xa0] sm:$0xff] }
  0x89   :  { %1875 = vmatprep.subr.bf16.mxu0 %v2576_v33  ;;  %v29_v32 = vld [vmem:[%s3662_s0 + $0x60] sm:$0xff] }
  0x8a   :  { %v45_v33 = vld [vmem:[%s3662_s0 + $0xe0] sm:$0xff] }
  0x8b   :  { %1704 = vmatpush1.bf16.msra.mxu1 %v2571_v37  ;;  %v53_v37 = vpack.c.bf16 %v37_v31, %v21_v30  ;;  %v61_v38 = vpack.c.bf16 %v45_v33, %v29_v32  ;;  %v2735_v30 = vld [vmem:[%s3661_s1 + $0x3d4] ss:$8 sps:$4 sm:$0xff]   ;;  %v2733_v32 = vld [vmem:[%s3661_s1 + $0x3d0] ss:$8 sps:$4 sm:$0xff]  }
  0x8c   :  { %1876 = vmatpush1.bf16.msra.mxu0 %v2574_v40  ;;  %1705 = vmatprep.subr.bf16.mxu1 %v2579_v42  ;;  %v32_v40 = vld [vmem:[%s3662_s0 + $0x78] sm:$0xff]  ;;  %v2655_v42 = vld [vmem:[%s3661_s1 + $0x300] ss:$8 sps:$4 sm:$0xff]  }
  0x8d   :  { %1877 = vmatprep.subr.bf16.mxu0 %v2582_v43  ;;  %v2658_v43 = vld [vmem:[%s3661_s1 + $0x700] ss:$8 sps:$4 sm:$0xff]   ;;  %v2738_v31 = vld [vmem:[%s3661_s1 + $0x7d4] ss:$8 sps:$4 sm:$0xff]   ;;  %v2736_v33 = vld [vmem:[%s3661_s1 + $0x7d0] ss:$8 sps:$4 sm:$0xff]  }
  0x8f   :  { %1706 = vmatpush1.bf16.msra.mxu1 %v2577_v44  ;;  %v2663_v44 = vld [vmem:[%s3661_s1 + $0x314] ss:$8 sps:$4 sm:$0xff]  }
  0x90   :  { %1878 = vmatpush1.bf16.msra.mxu0 %v2580_v45  ;;  %1707 = vmatprep.subr.bf16.mxu1 %v2585_v46  ;;  %v2666_v45 = vld [vmem:[%s3661_s1 + $0x714] ss:$8 sps:$4 sm:$0xff]   ;;  %v56_v46 = vpack.c.bf16 %v40_v39, %v24_v36  ;;  %v2739_v36 = vld [vmem:[%s3661_s1 + $0x3e0] ss:$8 sps:$4 sm:$0xff]  }
  0x91   :  { %1879 = vmatprep.subr.bf16.mxu0 %v2588_v47  ;;  %v64_v47 = vpack.c.bf16 %v48_v41, %v32_v40  ;;  %v2750_v39 = vld [vmem:[%s3661_s1 + $0x7f4] ss:$8 sps:$4 sm:$0xff]   ;;  %v2745_v40 = vld [vmem:[%s3661_s1 + $0x3f0] ss:$8 sps:$4 sm:$0xff]  }
  0x92   :  { %v2748_v41 = vld [vmem:[%s3661_s1 + $0x7f0] ss:$8 sps:$4 sm:$0xff]  }
  0x93   :  { %1708 = vmatpush1.bf16.msra.mxu1 %v2583_v48  ;;  %v2661_v48 = vld [vmem:[%s3661_s1 + $0x310] ss:$8 sps:$4 sm:$0xff]  }
  0x94   :  { %1880 = vmatpush1.bf16.msra.mxu0 %v2586_v49  ;;  %1709 = vmatprep.subr.bf16.mxu1 %v2591_v50  ;;  %v2664_v49 = vld [vmem:[%s3661_s1 + $0x710] ss:$8 sps:$4 sm:$0xff]   ;;  %v2669_v50 = vld [vmem:[%s3661_s1 + $0x324] ss:$8 sps:$4 sm:$0xff]  }
  0x95   :  { %1881 = vmatprep.subr.bf16.mxu0 %v2594_v51  ;;  %v2672_v51 = vld [vmem:[%s3661_s1 + $0x724] ss:$8 sps:$4 sm:$0xff]  }
  0x97   :  { %1710 = vmatpush1.bf16.msra.mxu1 %v2589_v52  ;;  %v2667_v52 = vld [vmem:[%s3661_s1 + $0x320] ss:$8 sps:$4 sm:$0xff]  }
  0x98   :  { %1882 = vmatpush1.bf16.msra.mxu0 %v2592_v53  ;;  %1711 = vmatprep.subr.bf16.mxu1 %v2597_v54  ;;  %v2670_v53 = vld [vmem:[%s3661_s1 + $0x720] ss:$8 sps:$4 sm:$0xff]   ;;  %v2675_v54 = vld [vmem:[%s3661_s1 + $0x334] ss:$8 sps:$4 sm:$0xff]  }
  0x99   :  { %1883 = vmatprep.subr.bf16.mxu0 %v2600_v55  ;;  %v2678_v55 = vld [vmem:[%s3661_s1 + $0x734] ss:$8 sps:$4 sm:$0xff]  }
  0x9b   :  { %1712 = vmatpush1.bf16.msra.mxu1 %v2595_v56  ;;  %v2673_v56 = vld [vmem:[%s3661_s1 + $0x330] ss:$8 sps:$4 sm:$0xff]  }
  0x9c   :  { %1884 = vmatpush1.bf16.msra.mxu0 %v2598_v57  ;;  %1713 = vmatprep.subr.bf16.mxu1 %v2603_v58  ;;  %v2676_v57 = vld [vmem:[%s3661_s1 + $0x730] ss:$8 sps:$4 sm:$0xff]   ;;  %v2681_v58 = vld [vmem:[%s3661_s1 + $0x344] ss:$8 sps:$4 sm:$0xff]  }
  0x9d   :  { %1885 = vmatprep.subr.bf16.mxu0 %v2606_v59  ;;  %v2684_v59 = vld [vmem:[%s3661_s1 + $0x744] ss:$8 sps:$4 sm:$0xff]  }
  0x9f   :  { %1714 = vmatpush1.bf16.msra.mxu1 %v2601_v60  ;;  %v2679_v60 = vld [vmem:[%s3661_s1 + $0x340] ss:$8 sps:$4 sm:$0xff]  }
  0xa0   :  { %1886 = vmatpush1.bf16.msra.mxu0 %v2604_v61  ;;  %1715 = vmatprep.subr.bf16.mxu1 %v2609_v62  ;;  %v2682_v61 = vld [vmem:[%s3661_s1 + $0x740] ss:$8 sps:$4 sm:$0xff]   ;;  %v2687_v62 = vld [vmem:[%s3661_s1 + $0x354] ss:$8 sps:$4 sm:$0xff]  }
  0xa1   :  { %1887 = vmatprep.subr.bf16.mxu0 %v2612_v63  ;;  %v2690_v63 = vld [vmem:[%s3661_s1 + $0x754] ss:$8 sps:$4 sm:$0xff]  }
  0xa3   :  { %1716 = vmatpush1.bf16.msra.mxu1 %v2607_v0  ;;  %v2685_v0 = vld [vmem:[%s3661_s1 + $0x350] ss:$8 sps:$4 sm:$0xff]  }
  0xa4   :  { %1888 = vmatpush1.bf16.msra.mxu0 %v2610_v1  ;;  %1717 = vmatprep.subr.bf16.mxu1 %v2615_v2  ;;  %v2688_v1 = vld [vmem:[%s3661_s1 + $0x750] ss:$8 sps:$4 sm:$0xff]   ;;  %v2693_v2 = vld [vmem:[%s3661_s1 + $0x364] ss:$8 sps:$4 sm:$0xff]  }
  0xa5   :  { %1889 = vmatprep.subr.bf16.mxu0 %v2618_v3  ;;  %v2696_v3 = vld [vmem:[%s3661_s1 + $0x764] ss:$8 sps:$4 sm:$0xff]  }
  0xa7   :  { %1718 = vmatpush1.bf16.msra.mxu1 %v2613_v4  ;;  %v2691_v4 = vld [vmem:[%s3661_s1 + $0x360] ss:$8 sps:$4 sm:$0xff]  }
  0xa8   :  { %1890 = vmatpush1.bf16.msra.mxu0 %v2616_v5  ;;  %1719 = vmatprep.subr.bf16.mxu1 %v2621_v6  ;;  %v2694_v5 = vld [vmem:[%s3661_s1 + $0x760] ss:$8 sps:$4 sm:$0xff]   ;;  %v2699_v6 = vld [vmem:[%s3661_s1 + $0x374] ss:$8 sps:$4 sm:$0xff]  }
  0xa9   :  { %1891 = vmatprep.subr.bf16.mxu0 %v2624_v7  ;;  %v2702_v7 = vld [vmem:[%s3661_s1 + $0x774] ss:$8 sps:$4 sm:$0xff]  }
  0xab   :  { %1720 = vmatpush1.bf16.msra.mxu1 %v2619_v8  ;;  %v2697_v8 = vld [vmem:[%s3661_s1 + $0x370] ss:$8 sps:$4 sm:$0xff]  }
  0xac   :  { %1892 = vmatpush1.bf16.msra.mxu0 %v2622_v9  ;;  %1721 = vmatprep.subr.bf16.mxu1 %v2627_v10  ;;  %v2700_v9 = vld [vmem:[%s3661_s1 + $0x770] ss:$8 sps:$4 sm:$0xff]   ;;  %v2705_v10 = vld [vmem:[%s3661_s1 + $0x384] ss:$8 sps:$4 sm:$0xff]  }
  0xad   :  { %1893 = vmatprep.subr.bf16.mxu0 %v2630_v11  ;;  %v2708_v11 = vld [vmem:[%s3661_s1 + $0x784] ss:$8 sps:$4 sm:$0xff]  }
  0xaf   :  { %1722 = vmatpush1.bf16.msra.mxu1 %v2625_v12  ;;  %v2703_v12 = vld [vmem:[%s3661_s1 + $0x380] ss:$8 sps:$4 sm:$0xff]  }
  0xb0   :  { %1894 = vmatpush1.bf16.msra.mxu0 %v2628_v13  ;;  %1723 = vmatprep.subr.bf16.mxu1 %v2633_v14  ;;  %v2706_v13 = vld [vmem:[%s3661_s1 + $0x780] ss:$8 sps:$4 sm:$0xff]   ;;  %v2711_v14 = vld [vmem:[%s3661_s1 + $0x394] ss:$8 sps:$4 sm:$0xff]  }
  0xb1   :  { %1895 = vmatprep.subr.bf16.mxu0 %v2636_v15  ;;  %v2714_v15 = vld [vmem:[%s3661_s1 + $0x794] ss:$8 sps:$4 sm:$0xff]  }
  0xb3   :  { %1724 = vmatpush1.bf16.msra.mxu1 %v2631_v16  ;;  %v2709_v16 = vld [vmem:[%s3661_s1 + $0x390] ss:$8 sps:$4 sm:$0xff]  }
  0xb4   :  { %1896 = vmatpush1.bf16.msra.mxu0 %v2634_v17  ;;  %1725 = vmatprep.subr.bf16.mxu1 %v2639_v18  ;;  %v2712_v17 = vld [vmem:[%s3661_s1 + $0x790] ss:$8 sps:$4 sm:$0xff]   ;;  %v2717_v18 = vld [vmem:[%s3661_s1 + $0x3a4] ss:$8 sps:$4 sm:$0xff]  }
  0xb5   :  { %1897 = vmatprep.subr.bf16.mxu0 %v2642_v19  ;;  %v2720_v19 = vld [vmem:[%s3661_s1 + $0x7a4] ss:$8 sps:$4 sm:$0xff]  }
  0xb7   :  { %1726 = vmatpush1.bf16.msra.mxu1 %v2637_v20  ;;  %v2715_v20 = vld [vmem:[%s3661_s1 + $0x3a0] ss:$8 sps:$4 sm:$0xff]  }
  0xb8   :  { %1898 = vmatpush1.bf16.msra.mxu0 %v2640_v21  ;;  %1727 = vmatprep.subr.bf16.mxu1 %v2645_v22  ;;  %v2718_v21 = vld [vmem:[%s3661_s1 + $0x7a0] ss:$8 sps:$4 sm:$0xff]   ;;  %v2723_v22 = vld [vmem:[%s3661_s1 + $0x3b4] ss:$8 sps:$4 sm:$0xff]  }
  0xb9   :  { %1899 = vmatprep.subr.bf16.mxu0 %v2648_v23  ;;  %v2726_v23 = vld [vmem:[%s3661_s1 + $0x7b4] ss:$8 sps:$4 sm:$0xff]  }
  0xbb   :  { %1728 = vmatpush1.bf16.msra.mxu1 %v2643_v24  ;;  %v2721_v24 = vld [vmem:[%s3661_s1 + $0x3b0] ss:$8 sps:$4 sm:$0xff]  }
  0xbc   :  { %1900 = vmatpush1.bf16.msra.mxu0 %v2646_v25  ;;  %1729 = vmatprep.subr.bf16.mxu1 %v2651_v26  ;;  %v2724_v25 = vld [vmem:[%s3661_s1 + $0x7b0] ss:$8 sps:$4 sm:$0xff]   ;;  %v2729_v26 = vld [vmem:[%s3661_s1 + $0x3c4] ss:$8 sps:$4 sm:$0xff]  }
  0xbd   :  { %1901 = vmatprep.subr.bf16.mxu0 %v2654_v27  ;;  %v2732_v27 = vld [vmem:[%s3661_s1 + $0x7c4] ss:$8 sps:$4 sm:$0xff]  }
  0xbf   :  { %1730 = vmatpush1.bf16.msra.mxu1 %v2649_v28  ;;  %v2727_v28 = vld [vmem:[%s3661_s1 + $0x3c0] ss:$8 sps:$4 sm:$0xff]  }
  0xc0   :  { %1902 = vmatpush1.bf16.msra.mxu0 %v2652_v29  ;;  %1742 = vmatprep.subr.bf16.mxu1 %v2657_v34  ;;  %v2730_v29 = vld [vmem:[%s3661_s1 + $0x7c0] ss:$8 sps:$4 sm:$0xff]   ;;  %v2741_v34 = vld [vmem:[%s3661_s1 + $0x3e4] ss:$8 sps:$4 sm:$0xff]  }
  0xc1   :  { %1914 = vmatprep.subr.bf16.mxu0 %v2660_v35  ;;  %v2744_v35 = vld [vmem:[%s3661_s1 + $0x7e4] ss:$8 sps:$4 sm:$0xff]  }
  0xc2   :  { %1732 = vmatmul.mubr.bf16.vlgmr.msra.gmra.mrb[0].mxu1 %v53_v37  ;;  %v2742_v37 = vld [vmem:[%s3661_s1 + $0x7e0] ss:$8 sps:$4 sm:$0xff]  }
  0xc3   :  { %1904 = vmatmul.mubr.bf16.vlgmr.msra.gmra.mrb[0].mxu0 %v61_v38  ;;  %1743 = vmatpush1.bf16.msra.mxu1 %v2655_v42  ;;  %v2747_v38 = vld [vmem:[%s3661_s1 + $0x3f4] ss:$8 sps:$4 sm:$0xff]  }
  0xc4   :  { %1915 = vmatpush1.bf16.msra.mxu0 %v2658_v43  ;;  %1744 = vmatprep.subr.bf16.mxu1 %v2663_v44  ;;  %v23_v42 = vld [vmem:[%s3662_s0 + $0x30] sm:$0xff] }
  0xc5   :  { %1916 = vmatprep.subr.bf16.mxu0 %v2666_v45  ;;  %1774 = vmatprep.mubr.bf16.mxu1 %v56_v46  ;;  %v39_v43 = vld [vmem:[%s3662_s0 + $0xb0] sm:$0xff] }
  0xc6   :  { %1946 = vmatprep.mubr.bf16.mxu0 %v64_v47  ;;  %v31_v44 = vld [vmem:[%s3662_s0 + $0x70] sm:$0xff]  ;;  %v55_v46 = vpack.c.bf16 %v39_v43, %v23_v42 }
  0xc7   :  { %1745 = vmatpush1.bf16.msra.mxu1 %v2661_v48  ;;  %v47_v45 = vld [vmem:[%s3662_s0 + $0xf0] sm:$0xff]  ;;  %v323_v48 = vlaneseq }
  0xc8   :  { %1917 = vmatpush1.bf16.msra.mxu0 %v2664_v49  ;;  %1746 = vmatprep.subr.bf16.mxu1 %v2669_v50  ;;  %v63_v47 = vpack.c.bf16 %v47_v45, %v31_v44 }
  0xc9   :  { %1918 = vmatprep.subr.bf16.mxu0 %v2672_v51  ;;  %v324_v49 = vshrl.u32 %v323_v48, 7  ;;  %v321_v51 = vld [vmem:[%s3663_s2] sm:$0x3]  ;;  %vm2022_vm0 = vcmp.lt.s32.totalorder %v323_v48, 256 }
  0xcb   :  { %1747 = vmatpush1.bf16.msra.mxu1 %v2667_v52  ;;  %v325_v50 = vsub.s32 0, %v324_v49  ;;  %v329_v52 = vsub.s32 1, %v324_v49 }
  0xcc   :  { %1919 = vmatpush1.bf16.msra.mxu0 %v2670_v53  ;;  %1748 = vmatprep.subr.bf16.mxu1 %v2675_v54 }
  0xcd   :  { %1920 = vmatprep.subr.bf16.mxu0 %v2678_v55  ;;  %v326_v53 = vrot.slane %v321_v51, %v325_v50  ;;  %v330_v54 = vrot.slane %v321_v51, %v329_v52 }
  0xcf   :  { %1749 = vmatpush1.bf16.msra.mxu1 %v2673_v56 }
  0xd0   :  { %1921 = vmatpush1.bf16.msra.mxu0 %v2676_v57  ;;  %1750 = vmatprep.subr.bf16.mxu1 %v2681_v58 }
  0xd1   :  { %1922 = vmatprep.subr.bf16.mxu0 %v2684_v59 }
  0xd3   :  { %1751 = vmatpush1.bf16.msra.mxu1 %v2679_v60 }
  0xd4   :  { %1923 = vmatpush1.bf16.msra.mxu0 %v2682_v61  ;;  %1752 = vmatprep.subr.bf16.mxu1 %v2687_v62 }
  0xd5   :  { %1924 = vmatprep.subr.bf16.mxu0 %v2690_v63 }
  0xd7   :  { %1753 = vmatpush1.bf16.msra.mxu1 %v2685_v0 }
  0xd8   :  { %1925 = vmatpush1.bf16.msra.mxu0 %v2688_v1  ;;  %1754 = vmatprep.subr.bf16.mxu1 %v2693_v2 }
  0xd9   :  { %1926 = vmatprep.subr.bf16.mxu0 %v2696_v3 }
  0xdb   :  { %1755 = vmatpush1.bf16.msra.mxu1 %v2691_v4 }
  0xdc   :  { %1927 = vmatpush1.bf16.msra.mxu0 %v2694_v5  ;;  %1756 = vmatprep.subr.bf16.mxu1 %v2699_v6 }
  0xdd   :  { %1928 = vmatprep.subr.bf16.mxu0 %v2702_v7 }
  0xdf   :  { %1757 = vmatpush1.bf16.msra.mxu1 %v2697_v8 }
  0xe0   :  { %1929 = vmatpush1.bf16.msra.mxu0 %v2700_v9  ;;  %1758 = vmatprep.subr.bf16.mxu1 %v2705_v10 }
  0xe1   :  { %1930 = vmatprep.subr.bf16.mxu0 %v2708_v11 }
  0xe3   :  { %1759 = vmatpush1.bf16.msra.mxu1 %v2703_v12 }
  0xe4   :  { %1931 = vmatpush1.bf16.msra.mxu0 %v2706_v13  ;;  %1760 = vmatprep.subr.bf16.mxu1 %v2711_v14  ;;  %v2751_v14 = vmov 1966171168  }
  0xe5   :  { %1932 = vmatprep.subr.bf16.mxu0 %v2714_v15  ;;  %v2006_v15 = vunpack.c.l.s4 %v2751_v14 }
  0xe7   :  { %1761 = vmatpush1.bf16.msra.mxu1 %v2709_v16 }
  0xe8   :  { %1933 = vmatpush1.bf16.msra.mxu0 %v2712_v17  ;;  %1762 = vmatprep.subr.bf16.mxu1 %v2717_v18 }
  0xe9   :  { %1934 = vmatprep.subr.bf16.mxu0 %v2720_v19 }
  0xeb   :  { %1763 = vmatpush1.bf16.msra.mxu1 %v2715_v20 }
  0xec   :  { %1935 = vmatpush1.bf16.msra.mxu0 %v2718_v21  ;;  %1764 = vmatprep.subr.bf16.mxu1 %v2723_v22 }
  0xed   :  { %1936 = vmatprep.subr.bf16.mxu0 %v2726_v23 }
  0xef   :  { %1765 = vmatpush1.bf16.msra.mxu1 %v2721_v24 }
  0xf0   :  { %1937 = vmatpush1.bf16.msra.mxu0 %v2724_v25  ;;  %1766 = vmatprep.subr.bf16.mxu1 %v2729_v26  ;;  %v2007_v25 = vunpack.c.0.s8 %v2006_v15 }
  0xf1   :  { %1938 = vmatprep.subr.bf16.mxu0 %v2732_v27 }
  0xf3   :  { %1767 = vmatpush1.bf16.msra.mxu1 %v2727_v28 }
  0xf4   :  { %1939 = vmatpush1.bf16.msra.mxu0 %v2730_v29  ;;  %1768 = vmatprep.subr.bf16.mxu1 %v2735_v30 }
  0xf5   :  { %1940 = vmatprep.subr.bf16.mxu0 %v2738_v31 }
  0xf7   :  { %1769 = vmatpush1.bf16.msra.mxu1 %v2733_v32 }
  0xf8   :  { %1941 = vmatpush1.bf16.msra.mxu0 %v2736_v33  ;;  %1770 = vmatprep.subr.bf16.mxu1 %v2741_v34  ;;  %v2010_v34 = vsub.s32 %v2007_v25, %v324_v49 }
  0xf9   :  { %1942 = vmatprep.subr.bf16.mxu0 %v2744_v35 }
  0xfb   :  { %1771 = vmatpush1.bf16.msra.mxu1 %v2739_v36 }
  0xfc   :  { %1943 = vmatpush1.bf16.msra.mxu0 %v2742_v37  ;;  %1772 = vmatprep.subr.bf16.mxu1 %v2747_v38 }
  0xfd   :  { %1944 = vmatprep.subr.bf16.mxu0 %v2750_v39 }
  0xff   :  { %1773 = vmatpush1.bf16.msra.mxu1 %v2745_v40 }
 0x100   :  { %1945 = vmatpush1.bf16.msra.mxu0 %v2748_v41 }
 0x102   :  { %1775 = vmatmul.mubr.bf16.vlgmr.msra.gmra.mrb[0].mxu1 %v55_v46 }
 0x103   :  { %1947 = vmatmul.mubr.bf16.vlgmr.msra.gmra.mrb[0].mxu0 %v63_v47 }
 0x1d5   :  { %v1776_v55 = vpop.f32.mrb[0].mxu1 }
 0x1d6   :  { %v1948_v56 = vpop.f32.mrb[0].mxu0  ;;  %v2334_v57 = vadd.f32 %v1776_v55, %v326_v53  ;;  %v1778_v58 = vpop.f32.mrb[1].mxu1 }
 0x1d7   :  { %v1950_v59 = vpop.f32.mrb[1].mxu0  ;;  %v2336_v60 = vadd.f32 %v1778_v58, %v330_v54  ;;  %v1780_v61 = vpop.f32.mrb[2].mxu1 }
 0x1d8   :  { %v1952_v62 = vpop.f32.mrb[2].mxu0  ;;  %v2335_v63 = vadd.f32 %v2334_v57, %v1948_v56  ;;  %v2338_v0 = vadd.f32 %v1780_v61, %v326_v53  ;;  %v1782_v1 = vpop.f32.mrb[3].mxu1 }
 0x1d9   :  { %v1954_v2 = vpop.f32.mrb[3].mxu0  ;;  %v2337_v3 = vadd.f32 %v2336_v60, %v1950_v59  ;;  %v2340_v4 = vadd.f32 %v1782_v1, %v330_v54 }
 0x1da   :  { %v1989_v5 = vrot.slane %v2335_v63, 4  ;;  %v2025_v6 = vmul.f32 %v2335_v63, %v2335_v63  ;;  %v2339_v7 = vadd.f32 %v2338_v0, %v1952_v62 }
 0x1db   :  { %v1996_v8 = vrot.slane %v2337_v3, 4  ;;  %v2026_v9 = vmul.f32 %v2337_v3, %v2337_v3  ;;  %v2341_v10 = vadd.f32 %v2340_v4, %v1954_v2  ;;  %v2332_v11 = vpack.c.bf16 %v2337_v3, %v2335_v63 }
 0x1dc   :  { %v1990_v12 = vadd.f32 %v2335_v63, %v1989_v5  ;;  %v2030_v13 = vrot.slane %v2025_v6, 4 }
 0x1dd   :  { %v1997_v16 = vadd.f32 %v2337_v3, %v1996_v8  ;;  %v2037_v17 = vrot.slane %v2026_v9, 4  ;;  %v2333_v18 = vpack.c.bf16 %v2341_v10, %v2339_v7  ;;  %1969 = vst [vmem:[%s3664_s3] sm:$0xff] %v2332_v11 }
 0x1de   :  { %v1991_v19 = vrot.slane %v1990_v12, 2  ;;  %v2031_v20 = vadd.f32 %v2030_v13, %v2025_v6 }
 0x1df   :  { %v1998_v21 = vrot.slane %v1997_v16, 2  ;;  %v2038_v22 = vadd.f32 %v2037_v17, %v2026_v9  ;;  %1970 = vst [vmem:[%s3664_s3 + $0x8] sm:$0xff] %v2333_v18 }
 0x1e0   :  { %v1992_v23 = vadd.f32 %v1991_v19, %v1990_v12  ;;  %v2032_v24 = vrot.slane %v2031_v20, 2 }
 0x1e1   :  { %v1999_v26 = vadd.f32 %v1998_v21, %v1997_v16  ;;  %v2039_v27 = vrot.slane %v2038_v22, 2 }
 0x1e2   :  { %v1993_v28 = vrot.slane %v1992_v23, 1  ;;  %v2033_v29 = vadd.f32 %v2032_v24, %v2031_v20 }
 0x1e3   :  { %v2000_v30 = vrot.slane %v1999_v26, 1  ;;  %v2040_v31 = vadd.f32 %v2039_v27, %v2038_v22 }
 0x1e4   :  { %v1994_v32 = vadd.f32 %v1993_v28, %v1992_v23  ;;  %v2034_v33 = vrot.slane %v2033_v29, 1 }
 0x1e5   :  { %v2001_v35 = vadd.f32 %v2000_v30, %v1999_v26  ;;  %v2041_v36 = vrot.slane %v2040_v31, 1 }
 0x1e6   :  { %v2035_v37 = vadd.f32 %v2034_v33, %v2033_v29 }
 0x1e7   :  { %v2004_v38 = vcombine.low %v1994_v32, %v2001_v35  ;;  %v2042_v39 = vadd.f32 %v2041_v36, %v2040_v31 }
 0x1e9   :  { %v2011_v40 = vrot.slane %v2004_v38, %v2010_v34  ;;  %v2045_v41 = vcombine.low %v2035_v37, %v2042_v39 }
 0x1eb   :  { %v2018_v42 = vrot.slane %v2011_v40, %v2010_v34  ;;  %v2052_v43 = vrot.slane %v2045_v41, %v2010_v34 }
 0x1ed   :  { %2024 = vst.msk [vmem:[%s3665_s4] sm:$0x3] %vm2022_vm0, %v2018_v42  ;;  %v2059_v44 = vrot.slane %v2052_v43, %v2010_v34 }
 0x1ef   :  { %2061 = vst.msk [vmem:[%s3666_s5] sm:$0x3] %vm2022_vm0, %v2059_v44 }

</bundles_post_ra>
